<compile_context>
chip_gen: v7x
topology: tpu7x:2x2x1
jax: 0.10.0
libtpu: 0.0.40
codegen_flags: <defaults>
</compile_context>

<pallas_src>
from itertools import combinations

import numpy as np
import jax
import jax.numpy as jnp
from jax import lax
from jax.experimental import pallas as pl
from jax.experimental.pallas import tpu as pltpu


# ------------------------------ helpers ------------------------------------

def _batch_tile(B, block_b=256):
    """Batch tile: multiple of 8, <= block_b; B is padded up to a multiple."""
    TB = min(block_b, ((B + 7) // 8) * 8)
    TB = max(8, (TB // 8) * 8)
    B_pad = ((B + TB - 1) // TB) * TB
    return TB, B_pad


def fold_bn_into_linear(w, b, gamma, beta, mu, var, eps=1e-5):
    """Fold eval-mode BatchNorm1d into the preceding Linear.

    w: [d_out, d_in] (nn.Linear layout).  Returns (w_T [d_in, d_out],
    b [1, d_out]) so the kernel uses the MXU-preferred  h @ W  form.
    """
    s = gamma * lax.rsqrt(var + eps)
    return w.T * s, (b - mu) * s + beta


def _pack_blockdiag(w_bi, TP, P_pad, D):
    """Pack per-pair [D, D] nn.Linear weights into per-pair-tile block-diagonal
    [TP*D, TP*D] matrices (pre-transposed so the kernel does x_i @ W)."""
    P = w_bi.shape[0]
    wT = jnp.transpose(w_bi, (0, 2, 1))                       # x @ W^T semantics
    if P_pad != P:
        wT = jnp.concatenate([wT, jnp.zeros((P_pad - P, D, D), wT.dtype)], 0)
    n_pt = P_pad // TP
    wT = wT.reshape(n_pt, TP, D, D)
    eye = jnp.eye(TP, dtype=wT.dtype)
    blk = wT[:, :, None, :, :] * eye[None, :, :, None, None]  # [n_pt, a, b, r, c]
    blk = blk.transpose(0, 1, 3, 2, 4).reshape(n_pt, TP * D, TP * D)
    return blk


# --------------------------- fused FiBiNET kernel ----------------------------

def _make_fused_kernel(TB, TP, D, n_tail):
    """n_tail = number of (w, b) pairs applied after the fused first GEMM
    (hidden layers 2..n plus the final projection)."""

    def kernel(*refs):
        i_ref, j_ref = refs[0], refs[1]
        (x_ref, w1_ref, w2_ref, wblk_ref, w0r_ref, w0s_ref, b0_ref) = refs[2:9]
        tail = refs[9:9 + 2 * n_tail]
        xlin_ref = refs[9 + 2 * n_tail]
        out_ref = refs[10 + 2 * n_tail]
        xse_sc = refs[11 + 2 * n_tail]          # [F, 2*TB, D] raw+SE slab
        acc_sc = refs[12 + 2 * n_tail]          # [TB, h0]     first-GEMM acc

        pt = pl.program_id(1)

        # ---- once per batch tile: SENet + fused raw/SE slab + acc init ----
        @pl.when(pt == 0)
        def _prep():
            x = x_ref[...]                                       # [F, TB, D]
            z = jnp.mean(x, axis=-1)                             # [F, TB]
            a = jnp.maximum(jnp.dot(w1_ref[...], z,
                                    preferred_element_type=jnp.float32), 0.0)
            a = jnp.maximum(jnp.dot(w2_ref[...], a,
                                    preferred_element_type=jnp.float32), 0.0)
            xse_sc[:, :TB, :] = x                                # raw half
            xse_sc[:, TB:, :] = x * a[:, :, None]                # SE half
            acc_sc[...] = jnp.zeros_like(acc_sc)

        # ---- gather the TP (i, j) fields of this pair tile (lane-dense slabs)
        base = pt * TP
        xi = jnp.concatenate([xse_sc[i_ref[base + t]] for t in range(TP)],
                             axis=-1)                            # [2*TB, TP*D]
        xj = jnp.concatenate([xse_sc[j_ref[base + t]] for t in range(TP)],
                             axis=-1)                            # [2*TB, TP*D]

        # ---- packed block-diagonal bilinear: one MXU push covers TP pairs and
        #      both (raw, SE) paths at once.
        res = jnp.dot(xi, wblk_ref[0],
                      preferred_element_type=jnp.float32) * xj   # [2*TB, TP*D]

        # ---- fused first MLP GEMM: this pair tile is one K-tile of x_int @ W0
        acc_sc[...] += (
            jnp.dot(res[:TB], w0r_ref[...], preferred_element_type=jnp.float32)
            + jnp.dot(res[TB:], w0s_ref[...], preferred_element_type=jnp.float32))

        # ---- MLP tail + wide residual + sigmoid at the last pair tile ----
        @pl.when(pt == pl.num_programs(1) - 1)
        def _tail():
            h = jnp.maximum(acc_sc[...] + b0_ref[...], 0.0)
            for l in range(n_tail - 1):
                w, b = tail[2 * l], tail[2 * l + 1]
                h = jnp.maximum(
                    jnp.dot(h, w[...], preferred_element_type=jnp.float32) + b[...],
                    0.0)
            wf, bf = tail[-2], tail[-1]
            deep = jnp.dot(h, wf[...], preferred_element_type=jnp.float32) + bf[...]
            out_ref[...] = jax.nn.sigmoid(deep + xlin_ref[...]).astype(out_ref.dtype)

    return kernel


def fibinet_fused_pallas(i_idx, j_idx, x_fbd, se_w1, se_w2, w_blk,
                         w0_raw, w0_se, b0, tail_params, x_lin, *, TB, TP):
    F, B_pad, D = x_fbd.shape
    TPD = TP * D
    n_pt = w_blk.shape[0]
    h0 = w0_raw.shape[1]
    n_tail = len(tail_params)
    tail_flat = [a for wb in tail_params for a in wb]

    def _const2(b, pt, i, j):
        return (0, 0)

    in_specs = [
        pl.BlockSpec((F, TB, D), lambda b, pt, i, j: (0, b, 0)),     # embeddings
        pl.BlockSpec(se_w1.shape, _const2),                          # SENet W1
        pl.BlockSpec(se_w2.shape, _const2),                          # SENet W2
        pl.BlockSpec((1, TPD, TPD), lambda b, pt, i, j: (pt, 0, 0)), # bilinear W tile
        pl.BlockSpec((TPD, h0), lambda b, pt, i, j: (pt, 0)),        # W0 K-tile (raw)
        pl.BlockSpec((TPD, h0), lambda b, pt, i, j: (pt, 0)),        # W0 K-tile (SE)
        pl.BlockSpec(b0.shape, _const2),                             # folded bias 0
    ]
    in_specs += [pl.BlockSpec(a.shape, _const2) for a in tail_flat]  # MLP tail params
    in_specs.append(pl.BlockSpec((TB, 1), lambda b, pt, i, j: (b, 0)))  # wide residual

    grid_spec = pltpu.PrefetchScalarGridSpec(
        num_scalar_prefetch=2,
        grid=(B_pad // TB, n_pt),
        in_specs=in_specs,
        out_specs=pl.BlockSpec((TB, 1), lambda b, pt, i, j: (b, 0)),
        scratch_shapes=[pltpu.VMEM((F, 2 * TB, D), jnp.float32),
                        pltpu.VMEM((TB, h0), jnp.float32)],
    )
    return pl.pallas_call(
        _make_fused_kernel(TB, TP, D, n_tail),
        grid_spec=grid_spec,
        out_shape=jax.ShapeDtypeStruct((B_pad, 1), jnp.float32),
        compiler_params=pltpu.CompilerParams(
            dimension_semantics=("parallel", "arbitrary")),
    )(i_idx, j_idx, x_fbd, se_w1, se_w2, w_blk, w0_raw, w0_se, b0,
      *tail_flat, x_lin)


# ------------------------------ parameters ----------------------------------

def init_params(key, num_dense, categories, d_embed, hidden_units, reduction_ratio=3):
    F = num_dense + len(categories)
    P = F * (F - 1) // 2
    n_cat = int(sum(categories))
    keys = iter(jax.random.split(key, 64))

    def nrm(shape, scale=0.1):
        return scale * jax.random.normal(next(keys), shape, dtype=jnp.float32)

    params = {
        'num_lin_w': nrm((1, num_dense)),
        'num_lin_b': nrm((1,)),
        'cat_lin_emb': nrm((n_cat, 1)),
        'cat_lin_b': jnp.zeros((1,), jnp.float32),
        'offsets': jnp.cumsum(jnp.array([0] + list(categories[:-1]), jnp.int32)),
        'num_emb_w': nrm((num_dense, 1, d_embed)),
        'cat_emb_w': nrm((n_cat, d_embed)),
    }
    R = max(1, int(F / reduction_ratio))
    params['se_w1'] = nrm((R, F))
    params['se_w2'] = nrm((F, R))
    params['bilinear_w'] = nrm((P, d_embed, d_embed))

    layer_params = []
    d_in = F * (F - 1) * d_embed
    for d in hidden_units:
        layer_params.append((
            nrm((d, d_in)),                      # W  (nn.Linear layout)
            nrm((1, d)),                         # bias
            jnp.ones((1, d), jnp.float32),       # BN gamma
            jnp.zeros((1, d), jnp.float32),      # BN beta
            jnp.zeros((1, d), jnp.float32),      # BN running mean
            jnp.ones((1, d), jnp.float32),       # BN running var
        ))
        d_in = d
    params['mlp_layers'] = layer_params
    params['mlp_final_w'] = nrm((1, d_in))
    params['mlp_final_b'] = nrm((1, 1))
    return params


# ----------------------------- forward (Pallas) ------------------------------

def fibinet_forward(x, params, num_dense, categories, *, block_b=256):
    B = x.shape[0]
    F = num_dense + len(categories)
    D = params['cat_emb_w'].shape[1]

    TB, B_pad = _batch_tile(B, block_b)
    if B_pad != B:                               # pad batch; padded rows discarded
        x = jnp.pad(x, ((0, B_pad - B), (0, 0)))

    dense = x[:, :num_dense]
    sparse = x[:, num_dense:].astype(jnp.int32)
    idx = sparse + params['offsets'][None, :]

    # ---- wide / linear part (tiny) ----
    # TODO(synk): embedding-table gathers (CatEmbedding / CatLinear) have no
    # clean rectangular BlockSpec; they stay as JAX glue feeding the kernel.
    x_lin = dense @ params['num_lin_w'].T + params['num_lin_b']
    x_lin = x_lin + jnp.sum(params['cat_lin_emb'][idx], axis=1) + params['cat_lin_b']

    # ---- embeddings built field-major [F, B_pad, D] (single HBM pass later) ----
    num_emb = dense.T[:, :, None] * params['num_emb_w'][:, 0, :][:, None, :]
    cat_emb = params['cat_emb_w'][idx.T]                         # [Fc, B_pad, D]
    x_fbd = jnp.concatenate([num_emb, cat_emb], axis=0)          # [F, B_pad, D]

    # ---- pair tables + packed block-diagonal bilinear weights ----
    pairs = list(combinations(range(F), 2))
    P = len(pairs)
    if D % 128 == 0:
        TP = 1
    elif 128 % D == 0:
        # MXU-native 256-wide pair tile when there are enough pairs (v6e/v7x),
        # otherwise a 128-wide tile (always fully utilizes v5e's 128-wide MXU).
        TP = 256 // D if P * D >= 256 else 128 // D
    else:
        # TODO(synk): pad d_embed so the pair-tile lane width is a multiple of 128.
        raise NotImplementedError("d_embed must divide 128 (or be a multiple of 128)")
    P_pad = ((P + TP - 1) // TP) * TP
    i_np = np.zeros((P_pad,), np.int32)
    j_np = np.zeros((P_pad,), np.int32)
    for p, (fi, fj) in enumerate(pairs):
        i_np[p], j_np[p] = fi, fj
    w_blk = _pack_blockdiag(params['bilinear_w'], TP, P_pad, D)  # [n_pt, TP*D, TP*D]

    # ---- fold eval-mode BN into the hidden Linears; split W0 into raw/SE streams
    # TODO(synk): BatchNorm1d is modeled in eval mode (running stats, folded into
    # the Linear); train-mode batch statistics and Dropout are not modeled.
    hidden_wb = [fold_bn_into_linear(*lp) for lp in params['mlp_layers']]
    w0T, b0 = hidden_wb[0]                                       # [2*P*D, h0], [1, h0]
    PD = P * D
    h0 = w0T.shape[1]
    w0_raw, w0_se = w0T[:PD], w0T[PD:]
    pad_rows = P_pad * D - PD
    if pad_rows:                                                 # zero pair-padding
        z = jnp.zeros((pad_rows, h0), w0T.dtype)
        w0_raw = jnp.concatenate([w0_raw, z], axis=0)
        w0_se = jnp.concatenate([w0_se, z], axis=0)

    tail_params = list(hidden_wb[1:]) + [(params['mlp_final_w'].T,
                                          params['mlp_final_b'])]

    out = fibinet_fused_pallas(
        jnp.asarray(i_np), jnp.asarray(j_np), x_fbd,
        params['se_w1'], params['se_w2'], w_blk, w0_raw, w0_se, b0,
        tail_params, x_lin, TB=TB, TP=TP)
    return out[:B, 0]


# ----------------------------- pure-JAX reference ----------------------------

def fibinet_reference(x, params, num_dense, categories, eps=1e-5):
    B = x.shape[0]
    F = num_dense + len(categories)
    dense = x[:, :num_dense]
    sparse = x[:, num_dense:].astype(jnp.int32)
    idx = sparse + params['offsets'][None, :]

    x_lin = dense @ params['num_lin_w'].T + params['num_lin_b']
    x_lin = x_lin + jnp.sum(params['cat_lin_emb'][idx], axis=1) + params['cat_lin_b']

    num_emb = dense[:, :, None] * params['num_emb_w'][None, :, 0, :]
    cat_emb = params['cat_emb_w'][idx]
    x_emb = jnp.concatenate([num_emb, cat_emb], axis=1)          # [B, F, D]

    z = jnp.mean(x_emb, axis=-1)
    a = jnp.maximum(z @ params['se_w1'].T, 0.0)
    a = jnp.maximum(a @ params['se_w2'].T, 0.0)
    se_emb = x_emb * a[:, :, None]

    pairs = list(combinations(range(F), 2))

    def bilinear(emb):
        outs = []
        for p, (i, j) in enumerate(pairs):
            outs.append((emb[:, i, :] @ params['bilinear_w'][p].T) * emb[:, j, :])
        return jnp.stack(outs, axis=1)

    x_int = jnp.concatenate([bilinear(x_emb), bilinear(se_emb)], axis=1).reshape(B, -1)

    h = x_int
    for (w, b, g, beta, mu, var) in params['mlp_layers']:
        h = h @ w.T + b
        h = (h - mu) / jnp.sqrt(var + eps) * g + beta
        h = jnp.maximum(h, 0.0)
    deep = h @ params['mlp_final_w'].T + params['mlp_final_b']
    return jax.nn.sigmoid(deep + x_lin).reshape(B)


# ------------------------------------ main -----------------------------------

if __name__ == "__main__":
    num_dense = 3
    categories = [5, 4, 6]
    d_embed = 8
    hidden_units = [32, 16]
    B = 2

    key = jax.random.PRNGKey(0)
    k_param, k_dense, k_sparse = jax.random.split(key, 3)
    params = init_params(k_param, num_dense, categories, d_embed, hidden_units)

    dense_x = jax.random.normal(k_dense, (B, num_dense), dtype=jnp.float32)
    sparse_x = jax.random.randint(
        k_sparse, (B, len(categories)), 0, jnp.array(categories, jnp.int32)
    ).astype(jnp.float32)
    x = jnp.concatenate([dense_x, sparse_x], axis=1)             # [B, num_dense+num_sparse]

    out = jax.block_until_ready(fibinet_forward(x, params, num_dense, categories))
    ref = jax.block_until_ready(fibinet_reference(x, params, num_dense, categories))

    assert out.shape == (B,)
    assert np.allclose(np.asarray(out), np.asarray(ref), atol=1e-3, rtol=1e-3), (out, ref)

    print("KERNEL_OK")
</pallas_src>

<mosaic_0001>
module attributes {stable_mosaic.version = 11 : i64} {
  func.func @kernel(%arg0: i32, %arg1: i32, %arg2: memref<16xi32, #tpu.memory_space<smem>>, %arg3: memref<16xi32, #tpu.memory_space<smem>>, %arg4: memref<6x8x8xf32, #tpu.memory_space<vmem>>, %arg5: memref<2x6xf32, #tpu.memory_space<vmem>>, %arg6: memref<6x2xf32, #tpu.memory_space<vmem>>, %arg7: memref<1x128x128xf32, #tpu.memory_space<vmem>>, %arg8: memref<128x32xf32, #tpu.memory_space<vmem>>, %arg9: memref<128x32xf32, #tpu.memory_space<vmem>>, %arg10: memref<1x32xf32, #tpu.memory_space<vmem>>, %arg11: memref<32x16xf32, #tpu.memory_space<vmem>>, %arg12: memref<1x16xf32, #tpu.memory_space<vmem>>, %arg13: memref<16x1xf32, #tpu.memory_space<vmem>>, %arg14: memref<1x1xf32, #tpu.memory_space<vmem>>, %arg15: memref<8x1xf32, #tpu.memory_space<vmem>>, %arg16: memref<8x1xf32, #tpu.memory_space<vmem>>, %arg17: memref<6x16x8xf32, #tpu.memory_space<vmem>>, %arg18: memref<8x32xf32, #tpu.memory_space<vmem>>) attributes {dimension_semantics = [#tpu.dimension_semantics<parallel>, #tpu.dimension_semantics<arbitrary>], iteration_bounds = array<i64: 1, 1>, scalar_prefetch = 2 : i64, scratch_operands = 2 : i64, tpu.core_type = #tpu.core_type<tc>, window_params = [{transform_indices = @transform_0, window_bounds = array<i64: 6, 8, 8>}, {pipeline_mode = #tpu.pipeline_mode<synchronous>, transform_indices = @transform_1, window_bounds = array<i64: 2, 6>}, {pipeline_mode = #tpu.pipeline_mode<synchronous>, transform_indices = @transform_2, window_bounds = array<i64: 6, 2>}, {transform_indices = @transform_3, window_bounds = array<i64: 1, 128, 128>}, {transform_indices = @transform_4, window_bounds = array<i64: 128, 32>}, {transform_indices = @transform_5, window_bounds = array<i64: 128, 32>}, {pipeline_mode = #tpu.pipeline_mode<synchronous>, transform_indices = @transform_6, window_bounds = array<i64: 1, 32>}, {pipeline_mode = #tpu.pipeline_mode<synchronous>, transform_indices = @transform_7, window_bounds = array<i64: 32, 16>}, {pipeline_mode = #tpu.pipeline_mode<synchronous>, transform_indices = @transform_8, window_bounds = array<i64: 1, 16>}, {pipeline_mode = #tpu.pipeline_mode<synchronous>, transform_indices = @transform_9, window_bounds = array<i64: 16, 1>}, {pipeline_mode = #tpu.pipeline_mode<synchronous>, transform_indices = @transform_10, window_bounds = array<i64: 1, 1>}, {transform_indices = @transform_11, window_bounds = array<i64: 8, 1>}, {transform_indices = @transform_12, window_bounds = array<i64: 8, 1>}]} {
    %c0_i32 = arith.constant 0 : i32
    %0 = arith.cmpi eq, %arg1, %c0_i32 : i32
    %1 = arith.extui %0 : i1 to i32
    %c0_i32_0 = arith.constant 0 : i32
    %2 = arith.cmpi ne, %1, %c0_i32_0 : i32
    scf.if %2 {
      %c0_96 = arith.constant 0 : index
      %c0_97 = arith.constant 0 : index
      %c0_98 = arith.constant 0 : index
      %215 = vector.load %arg4[%c0_96, %c0_97, %c0_98] : memref<6x8x8xf32, #tpu.memory_space<vmem>>, vector<6x8x8xf32>
      %cst_99 = arith.constant dense<0.000000e+00> : vector<6x8xf32>
      %216 = vector.multi_reduction <add>, %215, %cst_99 [2] : vector<6x8x8xf32> to vector<6x8xf32>
      %cst_100 = arith.constant 8.000000e+00 : f32
      %217 = vector.broadcast %cst_100 : f32 to vector<6x8xf32>
      %218 = arith.divf %216, %217 : vector<6x8xf32>
      %c0_101 = arith.constant 0 : index
      %c0_102 = arith.constant 0 : index
      %219 = vector.load %arg5[%c0_101, %c0_102] : memref<2x6xf32, #tpu.memory_space<vmem>>, vector<2x6xf32>
      %cst_103 = arith.constant dense<0.000000e+00> : vector<2x8xf32>
      %220 = tpu.matmul %219, %218, %cst_103 {dimension_numbers = #tpu.dot_dimension_numbers<[1], [0], [0], [1], [0, 0, 1, 1], [], []>} : vector<2x6xf32>, vector<6x8xf32>, vector<2x8xf32> -> vector<2x8xf32>
      %cst_104 = arith.constant 0.000000e+00 : f32
      %221 = vector.broadcast %cst_104 : f32 to vector<2x8xf32>
      %222 = arith.maximumf %220, %221 : vector<2x8xf32>
      %c0_105 = arith.constant 0 : index
      %c0_106 = arith.constant 0 : index
      %223 = vector.load %arg6[%c0_105, %c0_106] : memref<6x2xf32, #tpu.memory_space<vmem>>, vector<6x2xf32>
      %cst_107 = arith.constant dense<0.000000e+00> : vector<6x8xf32>
      %224 = tpu.matmul %223, %222, %cst_107 {dimension_numbers = #tpu.dot_dimension_numbers<[1], [0], [0], [1], [0, 0, 1, 1], [], []>} : vector<6x2xf32>, vector<2x8xf32>, vector<6x8xf32> -> vector<6x8xf32>
      %cst_108 = arith.constant 0.000000e+00 : f32
      %225 = vector.broadcast %cst_108 : f32 to vector<6x8xf32>
      %226 = arith.maximumf %224, %225 : vector<6x8xf32>
      %c0_109 = arith.constant 0 : index
      %c0_110 = arith.constant 0 : index
      %c0_111 = arith.constant 0 : index
      %227 = vector.load %arg17[%c0_109, %c0_110, %c0_111] : memref<6x16x8xf32, #tpu.memory_space<vmem>>, vector<6x8x8xf32>
      tpu.vector_store %arg17[%c0_109, %c0_110, %c0_111], %215 {strides = array<i32>} : memref<6x16x8xf32, #tpu.memory_space<vmem>>, vector<6x8x8xf32>,
      %228 = vector.shape_cast %226 : vector<6x8xf32> to vector<6x8x1xf32>
      %229 = vector.broadcast %228 : vector<6x8x1xf32> to vector<6x8x8xf32>
      %230 = arith.mulf %215, %229 : vector<6x8x8xf32>
      %c0_112 = arith.constant 0 : index
      %c8 = arith.constant 8 : index
      %c0_113 = arith.constant 0 : index
      %231 = vector.load %arg17[%c0_112, %c8, %c0_113] : memref<6x16x8xf32, #tpu.memory_space<vmem>>, vector<6x8x8xf32>
      tpu.vector_store %arg17[%c0_112, %c8, %c0_113], %230 {strides = array<i32>} : memref<6x16x8xf32, #tpu.memory_space<vmem>>, vector<6x8x8xf32>,
      %cst_114 = arith.constant 0.000000e+00 : f32
      %232 = vector.broadcast %cst_114 : f32 to vector<8x32xf32>
      %c0_115 = arith.constant 0 : index
      %c0_116 = arith.constant 0 : index
      %233 = vector.load %arg18[%c0_115, %c0_116] : memref<8x32xf32, #tpu.memory_space<vmem>>, vector<8x32xf32>
      tpu.vector_store %arg18[%c0_115, %c0_116], %232 {strides = array<i32>} : memref<8x32xf32, #tpu.memory_space<vmem>>, vector<8x32xf32>,
    } else {
    }
    %c16_i32 = arith.constant 16 : i32
    %3 = arith.muli %arg1, %c16_i32 : i32
    %c0_i32_1 = arith.constant 0 : i32
    %4 = arith.addi %3, %c0_i32_1 : i32
    %5 = arith.index_cast %4 : i32 to index
    %6 = memref.load %arg2[%5] : memref<16xi32, #tpu.memory_space<smem>>
    %7 = arith.index_cast %6 : i32 to index
    %c0 = arith.constant 0 : index
    %c0_2 = arith.constant 0 : index
    %8 = vector.load %arg17[%7, %c0, %c0_2] : memref<6x16x8xf32, #tpu.memory_space<vmem>>, vector<1x16x8xf32>
    %9 = vector.shape_cast %8 : vector<1x16x8xf32> to vector<16x8xf32>
    %c1_i32 = arith.constant 1 : i32
    %10 = arith.addi %3, %c1_i32 : i32
    %11 = arith.index_cast %10 : i32 to index
    %12 = memref.load %arg2[%11] : memref<16xi32, #tpu.memory_space<smem>>
    %13 = arith.index_cast %12 : i32 to index
    %c0_3 = arith.constant 0 : index
    %c0_4 = arith.constant 0 : index
    %14 = vector.load %arg17[%13, %c0_3, %c0_4] : memref<6x16x8xf32, #tpu.memory_space<vmem>>, vector<1x16x8xf32>
    %15 = vector.shape_cast %14 : vector<1x16x8xf32> to vector<16x8xf32>
    %c2_i32 = arith.constant 2 : i32
    %16 = arith.addi %3, %c2_i32 : i32
    %17 = arith.index_cast %16 : i32 to index
    %18 = memref.load %arg2[%17] : memref<16xi32, #tpu.memory_space<smem>>
    %19 = arith.index_cast %18 : i32 to index
    %c0_5 = arith.constant 0 : index
    %c0_6 = arith.constant 0 : index
    %20 = vector.load %arg17[%19, %c0_5, %c0_6] : memref<6x16x8xf32, #tpu.memory_space<vmem>>, vector<1x16x8xf32>
    %21 = vector.shape_cast %20 : vector<1x16x8xf32> to vector<16x8xf32>
    %c3_i32 = arith.constant 3 : i32
    %22 = arith.addi %3, %c3_i32 : i32
    %23 = arith.index_cast %22 : i32 to index
    %24 = memref.load %arg2[%23] : memref<16xi32, #tpu.memory_space<smem>>
    %25 = arith.index_cast %24 : i32 to index
    %c0_7 = arith.constant 0 : index
    %c0_8 = arith.constant 0 : index
    %26 = vector.load %arg17[%25, %c0_7, %c0_8] : memref<6x16x8xf32, #tpu.memory_space<vmem>>, vector<1x16x8xf32>
    %27 = vector.shape_cast %26 : vector<1x16x8xf32> to vector<16x8xf32>
    %c4_i32 = arith.constant 4 : i32
    %28 = arith.addi %3, %c4_i32 : i32
    %29 = arith.index_cast %28 : i32 to index
    %30 = memref.load %arg2[%29] : memref<16xi32, #tpu.memory_space<smem>>
    %31 = arith.index_cast %30 : i32 to index
    %c0_9 = arith.constant 0 : index
    %c0_10 = arith.constant 0 : index
    %32 = vector.load %arg17[%31, %c0_9, %c0_10] : memref<6x16x8xf32, #tpu.memory_space<vmem>>, vector<1x16x8xf32>
    %33 = vector.shape_cast %32 : vector<1x16x8xf32> to vector<16x8xf32>
    %c5_i32 = arith.constant 5 : i32
    %34 = arith.addi %3, %c5_i32 : i32
    %35 = arith.index_cast %34 : i32 to index
    %36 = memref.load %arg2[%35] : memref<16xi32, #tpu.memory_space<smem>>
    %37 = arith.index_cast %36 : i32 to index
    %c0_11 = arith.constant 0 : index
    %c0_12 = arith.constant 0 : index
    %38 = vector.load %arg17[%37, %c0_11, %c0_12] : memref<6x16x8xf32, #tpu.memory_space<vmem>>, vector<1x16x8xf32>
    %39 = vector.shape_cast %38 : vector<1x16x8xf32> to vector<16x8xf32>
    %c6_i32 = arith.constant 6 : i32
    %40 = arith.addi %3, %c6_i32 : i32
    %41 = arith.index_cast %40 : i32 to index
    %42 = memref.load %arg2[%41] : memref<16xi32, #tpu.memory_space<smem>>
    %43 = arith.index_cast %42 : i32 to index
    %c0_13 = arith.constant 0 : index
    %c0_14 = arith.constant 0 : index
    %44 = vector.load %arg17[%43, %c0_13, %c0_14] : memref<6x16x8xf32, #tpu.memory_space<vmem>>, vector<1x16x8xf32>
    %45 = vector.shape_cast %44 : vector<1x16x8xf32> to vector<16x8xf32>
    %c7_i32 = arith.constant 7 : i32
    %46 = arith.addi %3, %c7_i32 : i32
    %47 = arith.index_cast %46 : i32 to index
    %48 = memref.load %arg2[%47] : memref<16xi32, #tpu.memory_space<smem>>
    %49 = arith.index_cast %48 : i32 to index
    %c0_15 = arith.constant 0 : index
    %c0_16 = arith.constant 0 : index
    %50 = vector.load %arg17[%49, %c0_15, %c0_16] : memref<6x16x8xf32, #tpu.memory_space<vmem>>, vector<1x16x8xf32>
    %51 = vector.shape_cast %50 : vector<1x16x8xf32> to vector<16x8xf32>
    %c8_i32 = arith.constant 8 : i32
    %52 = arith.addi %3, %c8_i32 : i32
    %53 = arith.index_cast %52 : i32 to index
    %54 = memref.load %arg2[%53] : memref<16xi32, #tpu.memory_space<smem>>
    %55 = arith.index_cast %54 : i32 to index
    %c0_17 = arith.constant 0 : index
    %c0_18 = arith.constant 0 : index
    %56 = vector.load %arg17[%55, %c0_17, %c0_18] : memref<6x16x8xf32, #tpu.memory_space<vmem>>, vector<1x16x8xf32>
    %57 = vector.shape_cast %56 : vector<1x16x8xf32> to vector<16x8xf32>
    %c9_i32 = arith.constant 9 : i32
    %58 = arith.addi %3, %c9_i32 : i32
    %59 = arith.index_cast %58 : i32 to index
    %60 = memref.load %arg2[%59] : memref<16xi32, #tpu.memory_space<smem>>
    %61 = arith.index_cast %60 : i32 to index
    %c0_19 = arith.constant 0 : index
    %c0_20 = arith.constant 0 : index
    %62 = vector.load %arg17[%61, %c0_19, %c0_20] : memref<6x16x8xf32, #tpu.memory_space<vmem>>, vector<1x16x8xf32>
    %63 = vector.shape_cast %62 : vector<1x16x8xf32> to vector<16x8xf32>
    %c10_i32 = arith.constant 10 : i32
    %64 = arith.addi %3, %c10_i32 : i32
    %65 = arith.index_cast %64 : i32 to index
    %66 = memref.load %arg2[%65] : memref<16xi32, #tpu.memory_space<smem>>
    %67 = arith.index_cast %66 : i32 to index
    %c0_21 = arith.constant 0 : index
    %c0_22 = arith.constant 0 : index
    %68 = vector.load %arg17[%67, %c0_21, %c0_22] : memref<6x16x8xf32, #tpu.memory_space<vmem>>, vector<1x16x8xf32>
    %69 = vector.shape_cast %68 : vector<1x16x8xf32> to vector<16x8xf32>
    %c11_i32 = arith.constant 11 : i32
    %70 = arith.addi %3, %c11_i32 : i32
    %71 = arith.index_cast %70 : i32 to index
    %72 = memref.load %arg2[%71] : memref<16xi32, #tpu.memory_space<smem>>
    %73 = arith.index_cast %72 : i32 to index
    %c0_23 = arith.constant 0 : index
    %c0_24 = arith.constant 0 : index
    %74 = vector.load %arg17[%73, %c0_23, %c0_24] : memref<6x16x8xf32, #tpu.memory_space<vmem>>, vector<1x16x8xf32>
    %75 = vector.shape_cast %74 : vector<1x16x8xf32> to vector<16x8xf32>
    %c12_i32 = arith.constant 12 : i32
    %76 = arith.addi %3, %c12_i32 : i32
    %77 = arith.index_cast %76 : i32 to index
    %78 = memref.load %arg2[%77] : memref<16xi32, #tpu.memory_space<smem>>
    %79 = arith.index_cast %78 : i32 to index
    %c0_25 = arith.constant 0 : index
    %c0_26 = arith.constant 0 : index
    %80 = vector.load %arg17[%79, %c0_25, %c0_26] : memref<6x16x8xf32, #tpu.memory_space<vmem>>, vector<1x16x8xf32>
    %81 = vector.shape_cast %80 : vector<1x16x8xf32> to vector<16x8xf32>
    %c13_i32 = arith.constant 13 : i32
    %82 = arith.addi %3, %c13_i32 : i32
    %83 = arith.index_cast %82 : i32 to index
    %84 = memref.load %arg2[%83] : memref<16xi32, #tpu.memory_space<smem>>
    %85 = arith.index_cast %84 : i32 to index
    %c0_27 = arith.constant 0 : index
    %c0_28 = arith.constant 0 : index
    %86 = vector.load %arg17[%85, %c0_27, %c0_28] : memref<6x16x8xf32, #tpu.memory_space<vmem>>, vector<1x16x8xf32>
    %87 = vector.shape_cast %86 : vector<1x16x8xf32> to vector<16x8xf32>
    %c14_i32 = arith.constant 14 : i32
    %88 = arith.addi %3, %c14_i32 : i32
    %89 = arith.index_cast %88 : i32 to index
    %90 = memref.load %arg2[%89] : memref<16xi32, #tpu.memory_space<smem>>
    %91 = arith.index_cast %90 : i32 to index
    %c0_29 = arith.constant 0 : index
    %c0_30 = arith.constant 0 : index
    %92 = vector.load %arg17[%91, %c0_29, %c0_30] : memref<6x16x8xf32, #tpu.memory_space<vmem>>, vector<1x16x8xf32>
    %93 = vector.shape_cast %92 : vector<1x16x8xf32> to vector<16x8xf32>
    %c15_i32 = arith.constant 15 : i32
    %94 = arith.addi %3, %c15_i32 : i32
    %95 = arith.index_cast %94 : i32 to index
    %96 = memref.load %arg2[%95] : memref<16xi32, #tpu.memory_space<smem>>
    %97 = arith.index_cast %96 : i32 to index
    %c0_31 = arith.constant 0 : index
    %c0_32 = arith.constant 0 : index
    %98 = vector.load %arg17[%97, %c0_31, %c0_32] : memref<6x16x8xf32, #tpu.memory_space<vmem>>, vector<1x16x8xf32>
    %99 = vector.shape_cast %98 : vector<1x16x8xf32> to vector<16x8xf32>
    %100 = tpu.concatenate %9, %15, %21, %27, %33, %39, %45, %51, %57, %63, %69, %75, %81, %87, %93, %99 in 1 : vector<16x8xf32>, vector<16x8xf32>, vector<16x8xf32>, vector<16x8xf32>, vector<16x8xf32>, vector<16x8xf32>, vector<16x8xf32>, vector<16x8xf32>, vector<16x8xf32>, vector<16x8xf32>, vector<16x8xf32>, vector<16x8xf32>, vector<16x8xf32>, vector<16x8xf32>, vector<16x8xf32>, vector<16x8xf32> -> vector<16x128xf32>
    %c0_i32_33 = arith.constant 0 : i32
    %101 = arith.addi %3, %c0_i32_33 : i32
    %102 = arith.index_cast %101 : i32 to index
    %103 = memref.load %arg3[%102] : memref<16xi32, #tpu.memory_space<smem>>
    %104 = arith.index_cast %103 : i32 to index
    %c0_34 = arith.constant 0 : index
    %c0_35 = arith.constant 0 : index
    %105 = vector.load %arg17[%104, %c0_34, %c0_35] : memref<6x16x8xf32, #tpu.memory_space<vmem>>, vector<1x16x8xf32>
    %106 = vector.shape_cast %105 : vector<1x16x8xf32> to vector<16x8xf32>
    %c1_i32_36 = arith.constant 1 : i32
    %107 = arith.addi %3, %c1_i32_36 : i32
    %108 = arith.index_cast %107 : i32 to index
    %109 = memref.load %arg3[%108] : memref<16xi32, #tpu.memory_space<smem>>
    %110 = arith.index_cast %109 : i32 to index
    %c0_37 = arith.constant 0 : index
    %c0_38 = arith.constant 0 : index
    %111 = vector.load %arg17[%110, %c0_37, %c0_38] : memref<6x16x8xf32, #tpu.memory_space<vmem>>, vector<1x16x8xf32>
    %112 = vector.shape_cast %111 : vector<1x16x8xf32> to vector<16x8xf32>
    %c2_i32_39 = arith.constant 2 : i32
    %113 = arith.addi %3, %c2_i32_39 : i32
    %114 = arith.index_cast %113 : i32 to index
    %115 = memref.load %arg3[%114] : memref<16xi32, #tpu.memory_space<smem>>
    %116 = arith.index_cast %115 : i32 to index
    %c0_40 = arith.constant 0 : index
    %c0_41 = arith.constant 0 : index
    %117 = vector.load %arg17[%116, %c0_40, %c0_41] : memref<6x16x8xf32, #tpu.memory_space<vmem>>, vector<1x16x8xf32>
    %118 = vector.shape_cast %117 : vector<1x16x8xf32> to vector<16x8xf32>
    %c3_i32_42 = arith.constant 3 : i32
    %119 = arith.addi %3, %c3_i32_42 : i32
    %120 = arith.index_cast %119 : i32 to index
    %121 = memref.load %arg3[%120] : memref<16xi32, #tpu.memory_space<smem>>
    %122 = arith.index_cast %121 : i32 to index
    %c0_43 = arith.constant 0 : index
    %c0_44 = arith.constant 0 : index
    %123 = vector.load %arg17[%122, %c0_43, %c0_44] : memref<6x16x8xf32, #tpu.memory_space<vmem>>, vector<1x16x8xf32>
    %124 = vector.shape_cast %123 : vector<1x16x8xf32> to vector<16x8xf32>
    %c4_i32_45 = arith.constant 4 : i32
    %125 = arith.addi %3, %c4_i32_45 : i32
    %126 = arith.index_cast %125 : i32 to index
    %127 = memref.load %arg3[%126] : memref<16xi32, #tpu.memory_space<smem>>
    %128 = arith.index_cast %127 : i32 to index
    %c0_46 = arith.constant 0 : index
    %c0_47 = arith.constant 0 : index
    %129 = vector.load %arg17[%128, %c0_46, %c0_47] : memref<6x16x8xf32, #tpu.memory_space<vmem>>, vector<1x16x8xf32>
    %130 = vector.shape_cast %129 : vector<1x16x8xf32> to vector<16x8xf32>
    %c5_i32_48 = arith.constant 5 : i32
    %131 = arith.addi %3, %c5_i32_48 : i32
    %132 = arith.index_cast %131 : i32 to index
    %133 = memref.load %arg3[%132] : memref<16xi32, #tpu.memory_space<smem>>
    %134 = arith.index_cast %133 : i32 to index
    %c0_49 = arith.constant 0 : index
    %c0_50 = arith.constant 0 : index
    %135 = vector.load %arg17[%134, %c0_49, %c0_50] : memref<6x16x8xf32, #tpu.memory_space<vmem>>, vector<1x16x8xf32>
    %136 = vector.shape_cast %135 : vector<1x16x8xf32> to vector<16x8xf32>
    %c6_i32_51 = arith.constant 6 : i32
    %137 = arith.addi %3, %c6_i32_51 : i32
    %138 = arith.index_cast %137 : i32 to index
    %139 = memref.load %arg3[%138] : memref<16xi32, #tpu.memory_space<smem>>
    %140 = arith.index_cast %139 : i32 to index
    %c0_52 = arith.constant 0 : index
    %c0_53 = arith.constant 0 : index
    %141 = vector.load %arg17[%140, %c0_52, %c0_53] : memref<6x16x8xf32, #tpu.memory_space<vmem>>, vector<1x16x8xf32>
    %142 = vector.shape_cast %141 : vector<1x16x8xf32> to vector<16x8xf32>
    %c7_i32_54 = arith.constant 7 : i32
    %143 = arith.addi %3, %c7_i32_54 : i32
    %144 = arith.index_cast %143 : i32 to index
    %145 = memref.load %arg3[%144] : memref<16xi32, #tpu.memory_space<smem>>
    %146 = arith.index_cast %145 : i32 to index
    %c0_55 = arith.constant 0 : index
    %c0_56 = arith.constant 0 : index
    %147 = vector.load %arg17[%146, %c0_55, %c0_56] : memref<6x16x8xf32, #tpu.memory_space<vmem>>, vector<1x16x8xf32>
    %148 = vector.shape_cast %147 : vector<1x16x8xf32> to vector<16x8xf32>
    %c8_i32_57 = arith.constant 8 : i32
    %149 = arith.addi %3, %c8_i32_57 : i32
    %150 = arith.index_cast %149 : i32 to index
    %151 = memref.load %arg3[%150] : memref<16xi32, #tpu.memory_space<smem>>
    %152 = arith.index_cast %151 : i32 to index
    %c0_58 = arith.constant 0 : index
    %c0_59 = arith.constant 0 : index
    %153 = vector.load %arg17[%152, %c0_58, %c0_59] : memref<6x16x8xf32, #tpu.memory_space<vmem>>, vector<1x16x8xf32>
    %154 = vector.shape_cast %153 : vector<1x16x8xf32> to vector<16x8xf32>
    %c9_i32_60 = arith.constant 9 : i32
    %155 = arith.addi %3, %c9_i32_60 : i32
    %156 = arith.index_cast %155 : i32 to index
    %157 = memref.load %arg3[%156] : memref<16xi32, #tpu.memory_space<smem>>
    %158 = arith.index_cast %157 : i32 to index
    %c0_61 = arith.constant 0 : index
    %c0_62 = arith.constant 0 : index
    %159 = vector.load %arg17[%158, %c0_61, %c0_62] : memref<6x16x8xf32, #tpu.memory_space<vmem>>, vector<1x16x8xf32>
    %160 = vector.shape_cast %159 : vector<1x16x8xf32> to vector<16x8xf32>
    %c10_i32_63 = arith.constant 10 : i32
    %161 = arith.addi %3, %c10_i32_63 : i32
    %162 = arith.index_cast %161 : i32 to index
    %163 = memref.load %arg3[%162] : memref<16xi32, #tpu.memory_space<smem>>
    %164 = arith.index_cast %163 : i32 to index
    %c0_64 = arith.constant 0 : index
    %c0_65 = arith.constant 0 : index
    %165 = vector.load %arg17[%164, %c0_64, %c0_65] : memref<6x16x8xf32, #tpu.memory_space<vmem>>, vector<1x16x8xf32>
    %166 = vector.shape_cast %165 : vector<1x16x8xf32> to vector<16x8xf32>
    %c11_i32_66 = arith.constant 11 : i32
    %167 = arith.addi %3, %c11_i32_66 : i32
    %168 = arith.index_cast %167 : i32 to index
    %169 = memref.load %arg3[%168] : memref<16xi32, #tpu.memory_space<smem>>
    %170 = arith.index_cast %169 : i32 to index
    %c0_67 = arith.constant 0 : index
    %c0_68 = arith.constant 0 : index
    %171 = vector.load %arg17[%170, %c0_67, %c0_68] : memref<6x16x8xf32, #tpu.memory_space<vmem>>, vector<1x16x8xf32>
    %172 = vector.shape_cast %171 : vector<1x16x8xf32> to vector<16x8xf32>
    %c12_i32_69 = arith.constant 12 : i32
    %173 = arith.addi %3, %c12_i32_69 : i32
    %174 = arith.index_cast %173 : i32 to index
    %175 = memref.load %arg3[%174] : memref<16xi32, #tpu.memory_space<smem>>
    %176 = arith.index_cast %175 : i32 to index
    %c0_70 = arith.constant 0 : index
    %c0_71 = arith.constant 0 : index
    %177 = vector.load %arg17[%176, %c0_70, %c0_71] : memref<6x16x8xf32, #tpu.memory_space<vmem>>, vector<1x16x8xf32>
    %178 = vector.shape_cast %177 : vector<1x16x8xf32> to vector<16x8xf32>
    %c13_i32_72 = arith.constant 13 : i32
    %179 = arith.addi %3, %c13_i32_72 : i32
    %180 = arith.index_cast %179 : i32 to index
    %181 = memref.load %arg3[%180] : memref<16xi32, #tpu.memory_space<smem>>
    %182 = arith.index_cast %181 : i32 to index
    %c0_73 = arith.constant 0 : index
    %c0_74 = arith.constant 0 : index
    %183 = vector.load %arg17[%182, %c0_73, %c0_74] : memref<6x16x8xf32, #tpu.memory_space<vmem>>, vector<1x16x8xf32>
    %184 = vector.shape_cast %183 : vector<1x16x8xf32> to vector<16x8xf32>
    %c14_i32_75 = arith.constant 14 : i32
    %185 = arith.addi %3, %c14_i32_75 : i32
    %186 = arith.index_cast %185 : i32 to index
    %187 = memref.load %arg3[%186] : memref<16xi32, #tpu.memory_space<smem>>
    %188 = arith.index_cast %187 : i32 to index
    %c0_76 = arith.constant 0 : index
    %c0_77 = arith.constant 0 : index
    %189 = vector.load %arg17[%188, %c0_76, %c0_77] : memref<6x16x8xf32, #tpu.memory_space<vmem>>, vector<1x16x8xf32>
    %190 = vector.shape_cast %189 : vector<1x16x8xf32> to vector<16x8xf32>
    %c15_i32_78 = arith.constant 15 : i32
    %191 = arith.addi %3, %c15_i32_78 : i32
    %192 = arith.index_cast %191 : i32 to index
    %193 = memref.load %arg3[%192] : memref<16xi32, #tpu.memory_space<smem>>
    %194 = arith.index_cast %193 : i32 to index
    %c0_79 = arith.constant 0 : index
    %c0_80 = arith.constant 0 : index
    %195 = vector.load %arg17[%194, %c0_79, %c0_80] : memref<6x16x8xf32, #tpu.memory_space<vmem>>, vector<1x16x8xf32>
    %196 = vector.shape_cast %195 : vector<1x16x8xf32> to vector<16x8xf32>
    %197 = tpu.concatenate %106, %112, %118, %124, %130, %136, %142, %148, %154, %160, %166, %172, %178, %184, %190, %196 in 1 : vector<16x8xf32>, vector<16x8xf32>, vector<16x8xf32>, vector<16x8xf32>, vector<16x8xf32>, vector<16x8xf32>, vector<16x8xf32>, vector<16x8xf32>, vector<16x8xf32>, vector<16x8xf32>, vector<16x8xf32>, vector<16x8xf32>, vector<16x8xf32>, vector<16x8xf32>, vector<16x8xf32>, vector<16x8xf32> -> vector<16x128xf32>
    %c0_81 = arith.constant 0 : index
    %c0_82 = arith.constant 0 : index
    %c0_83 = arith.constant 0 : index
    %198 = vector.load %arg7[%c0_81, %c0_82, %c0_83] : memref<1x128x128xf32, #tpu.memory_space<vmem>>, vector<1x128x128xf32>
    %199 = vector.shape_cast %198 : vector<1x128x128xf32> to vector<128x128xf32>
    %cst = arith.constant dense<0.000000e+00> : vector<16x128xf32>
    %200 = tpu.matmul %100, %199, %cst {dimension_numbers = #tpu.dot_dimension_numbers<[1], [0], [0], [1], [0, 0, 1, 1], [], []>} : vector<16x128xf32>, vector<128x128xf32>, vector<16x128xf32> -> vector<16x128xf32>
    %201 = arith.mulf %200, %197 : vector<16x128xf32>
    %c0_84 = arith.constant 0 : index
    %c0_85 = arith.constant 0 : index
    %202 = vector.load %arg18[%c0_84, %c0_85] : memref<8x32xf32, #tpu.memory_space<vmem>>, vector<8x32xf32>
    %203 = vector.extract_strided_slice %201 {offsets = [0, 0], sizes = [8, 128], strides = [1, 1]} : vector<16x128xf32> to vector<8x128xf32>
    %c0_86 = arith.constant 0 : index
    %c0_87 = arith.constant 0 : index
    %204 = vector.load %arg8[%c0_86, %c0_87] : memref<128x32xf32, #tpu.memory_space<vmem>>, vector<128x32xf32>
    %cst_88 = arith.constant dense<0.000000e+00> : vector<8x32xf32>
    %205 = tpu.matmul %203, %204, %cst_88 {dimension_numbers = #tpu.dot_dimension_numbers<[1], [0], [0], [1], [0, 0, 1, 1], [], []>} : vector<8x128xf32>, vector<128x32xf32>, vector<8x32xf32> -> vector<8x32xf32>
    %206 = vector.extract_strided_slice %201 {offsets = [8, 0], sizes = [8, 128], strides = [1, 1]} : vector<16x128xf32> to vector<8x128xf32>
    %c0_89 = arith.constant 0 : index
    %c0_90 = arith.constant 0 : index
    %207 = vector.load %arg9[%c0_89, %c0_90] : memref<128x32xf32, #tpu.memory_space<vmem>>, vector<128x32xf32>
    %cst_91 = arith.constant dense<0.000000e+00> : vector<8x32xf32>
    %208 = tpu.matmul %206, %207, %cst_91 {dimension_numbers = #tpu.dot_dimension_numbers<[1], [0], [0], [1], [0, 0, 1, 1], [], []>} : vector<8x128xf32>, vector<128x32xf32>, vector<8x32xf32> -> vector<8x32xf32>
    %209 = arith.addf %205, %208 : vector<8x32xf32>
    %210 = arith.addf %202, %209 : vector<8x32xf32>
    %c0_92 = arith.constant 0 : index
    %c0_93 = arith.constant 0 : index
    %211 = vector.load %arg18[%c0_92, %c0_93] : memref<8x32xf32, #tpu.memory_space<vmem>>, vector<8x32xf32>
    tpu.vector_store %arg18[%c0_92, %c0_93], %210 {strides = array<i32>} : memref<8x32xf32, #tpu.memory_space<vmem>>, vector<8x32xf32>,
    %c0_i32_94 = arith.constant 0 : i32
    %212 = arith.cmpi eq, %arg1, %c0_i32_94 : i32
    %213 = arith.extui %212 : i1 to i32
    %c0_i32_95 = arith.constant 0 : i32
    %214 = arith.cmpi ne, %213, %c0_i32_95 : i32
    scf.if %214 {
      %c0_96 = arith.constant 0 : index
      %c0_97 = arith.constant 0 : index
      %215 = vector.load %arg18[%c0_96, %c0_97] : memref<8x32xf32, #tpu.memory_space<vmem>>, vector<8x32xf32>
      %c0_98 = arith.constant 0 : index
      %c0_99 = arith.constant 0 : index
      %216 = vector.load %arg10[%c0_98, %c0_99] : memref<1x32xf32, #tpu.memory_space<vmem>>, vector<1x32xf32>
      %217 = vector.broadcast %216 : vector<1x32xf32> to vector<8x32xf32>
      %218 = arith.addf %215, %217 : vector<8x32xf32>
      %cst_100 = arith.constant 0.000000e+00 : f32
      %219 = vector.broadcast %cst_100 : f32 to vector<8x32xf32>
      %220 = arith.maximumf %218, %219 : vector<8x32xf32>
      %c0_101 = arith.constant 0 : index
      %c0_102 = arith.constant 0 : index
      %221 = vector.load %arg11[%c0_101, %c0_102] : memref<32x16xf32, #tpu.memory_space<vmem>>, vector<32x16xf32>
      %cst_103 = arith.constant dense<0.000000e+00> : vector<8x16xf32>
      %222 = tpu.matmul %220, %221, %cst_103 {dimension_numbers = #tpu.dot_dimension_numbers<[1], [0], [0], [1], [0, 0, 1, 1], [], []>} : vector<8x32xf32>, vector<32x16xf32>, vector<8x16xf32> -> vector<8x16xf32>
      %c0_104 = arith.constant 0 : index
      %c0_105 = arith.constant 0 : index
      %223 = vector.load %arg12[%c0_104, %c0_105] : memref<1x16xf32, #tpu.memory_space<vmem>>, vector<1x16xf32>
      %224 = vector.broadcast %223 : vector<1x16xf32> to vector<8x16xf32>
      %225 = arith.addf %222, %224 : vector<8x16xf32>
      %cst_106 = arith.constant 0.000000e+00 : f32
      %226 = vector.broadcast %cst_106 : f32 to vector<8x16xf32>
      %227 = arith.maximumf %225, %226 : vector<8x16xf32>
      %c0_107 = arith.constant 0 : index
      %c0_108 = arith.constant 0 : index
      %228 = vector.load %arg13[%c0_107, %c0_108] : memref<16x1xf32, #tpu.memory_space<vmem>>, vector<16x1xf32>
      %cst_109 = arith.constant dense<0.000000e+00> : vector<8x1xf32>
      %229 = tpu.matmul %227, %228, %cst_109 {dimension_numbers = #tpu.dot_dimension_numbers<[1], [0], [0], [1], [0, 0, 1, 1], [], []>} : vector<8x16xf32>, vector<16x1xf32>, vector<8x1xf32> -> vector<8x1xf32>
      %c0_110 = arith.constant 0 : index
      %c0_111 = arith.constant 0 : index
      %230 = vector.load %arg14[%c0_110, %c0_111] : memref<1x1xf32, #tpu.memory_space<vmem>>, vector<1x1xf32>
      %231 = vector.broadcast %230 : vector<1x1xf32> to vector<8x1xf32>
      %232 = arith.addf %229, %231 : vector<8x1xf32>
      %c0_112 = arith.constant 0 : index
      %c0_113 = arith.constant 0 : index
      %233 = vector.load %arg15[%c0_112, %c0_113] : memref<8x1xf32, #tpu.memory_space<vmem>>, vector<8x1xf32>
      %234 = arith.addf %232, %233 : vector<8x1xf32>
      %235 = arith.negf %234 : vector<8x1xf32>
      %236 = math.exp %235 : vector<8x1xf32>
      %cst_114 = arith.constant 1.000000e+00 : f32
      %237 = vector.broadcast %cst_114 : f32 to vector<8x1xf32>
      %238 = arith.addf %237, %236 : vector<8x1xf32>
      %239 = arith.divf %237, %238 : vector<8x1xf32>
      %c0_115 = arith.constant 0 : index
      %c0_116 = arith.constant 0 : index
      %240 = vector.load %arg16[%c0_115, %c0_116] : memref<8x1xf32, #tpu.memory_space<vmem>>, vector<8x1xf32>
      tpu.vector_store %arg16[%c0_115, %c0_116], %239 {strides = array<i32>} : memref<8x1xf32, #tpu.memory_space<vmem>>, vector<8x1xf32>,
    } else {
    }
    return
  }
  func.func @transform_0(%arg0: i32, %arg1: i32, %arg2: memref<16xi32, #tpu.memory_space<smem>>, %arg3: memref<16xi32, #tpu.memory_space<smem>>) -> (i32, i32, i32) {
    %c0_i32 = arith.constant 0 : i32
    %c0_i32_0 = arith.constant 0 : i32
    %c0_i32_1 = arith.constant 0 : i32
    return %c0_i32, %arg0, %c0_i32_0 : i32, i32, i32
  }
  func.func @transform_1(%arg0: i32, %arg1: i32, %arg2: memref<16xi32, #tpu.memory_space<smem>>, %arg3: memref<16xi32, #tpu.memory_space<smem>>) -> (i32, i32) {
    %c0_i32 = arith.constant 0 : i32
    %c0_i32_0 = arith.constant 0 : i32
    %c0_i32_1 = arith.constant 0 : i32
    return %c0_i32, %c0_i32_0 : i32, i32
  }
  func.func @transform_2(%arg0: i32, %arg1: i32, %arg2: memref<16xi32, #tpu.memory_space<smem>>, %arg3: memref<16xi32, #tpu.memory_space<smem>>) -> (i32, i32) {
    %c0_i32 = arith.constant 0 : i32
    %c0_i32_0 = arith.constant 0 : i32
    %c0_i32_1 = arith.constant 0 : i32
    return %c0_i32, %c0_i32_0 : i32, i32
  }
  func.func @transform_3(%arg0: i32, %arg1: i32, %arg2: memref<16xi32, #tpu.memory_space<smem>>, %arg3: memref<16xi32, #tpu.memory_space<smem>>) -> (i32, i32, i32) {
    %c0_i32 = arith.constant 0 : i32
    %c0_i32_0 = arith.constant 0 : i32
    %c0_i32_1 = arith.constant 0 : i32
    return %arg1, %c0_i32, %c0_i32_0 : i32, i32, i32
  }
  func.func @transform_4(%arg0: i32, %arg1: i32, %arg2: memref<16xi32, #tpu.memory_space<smem>>, %arg3: memref<16xi32, #tpu.memory_space<smem>>) -> (i32, i32) {
    %c0_i32 = arith.constant 0 : i32
    %c0_i32_0 = arith.constant 0 : i32
    return %arg1, %c0_i32 : i32, i32
  }
  func.func @transform_5(%arg0: i32, %arg1: i32, %arg2: memref<16xi32, #tpu.memory_space<smem>>, %arg3: memref<16xi32, #tpu.memory_space<smem>>) -> (i32, i32) {
    %c0_i32 = arith.constant 0 : i32
    %c0_i32_0 = arith.constant 0 : i32
    return %arg1, %c0_i32 : i32, i32
  }
  func.func @transform_6(%arg0: i32, %arg1: i32, %arg2: memref<16xi32, #tpu.memory_space<smem>>, %arg3: memref<16xi32, #tpu.memory_space<smem>>) -> (i32, i32) {
    %c0_i32 = arith.constant 0 : i32
    %c0_i32_0 = arith.constant 0 : i32
    %c0_i32_1 = arith.constant 0 : i32
    return %c0_i32, %c0_i32_0 : i32, i32
  }
  func.func @transform_7(%arg0: i32, %arg1: i32, %arg2: memref<16xi32, #tpu.memory_space<smem>>, %arg3: memref<16xi32, #tpu.memory_space<smem>>) -> (i32, i32) {
    %c0_i32 = arith.constant 0 : i32
    %c0_i32_0 = arith.constant 0 : i32
    %c0_i32_1 = arith.constant 0 : i32
    return %c0_i32, %c0_i32_0 : i32, i32
  }
  func.func @transform_8(%arg0: i32, %arg1: i32, %arg2: memref<16xi32, #tpu.memory_space<smem>>, %arg3: memref<16xi32, #tpu.memory_space<smem>>) -> (i32, i32) {
    %c0_i32 = arith.constant 0 : i32
    %c0_i32_0 = arith.constant 0 : i32
    %c0_i32_1 = arith.constant 0 : i32
    return %c0_i32, %c0_i32_0 : i32, i32
  }
  func.func @transform_9(%arg0: i32, %arg1: i32, %arg2: memref<16xi32, #tpu.memory_space<smem>>, %arg3: memref<16xi32, #tpu.memory_space<smem>>) -> (i32, i32) {
    %c0_i32 = arith.constant 0 : i32
    %c0_i32_0 = arith.constant 0 : i32
    %c0_i32_1 = arith.constant 0 : i32
    return %c0_i32, %c0_i32_0 : i32, i32
  }
  func.func @transform_10(%arg0: i32, %arg1: i32, %arg2: memref<16xi32, #tpu.memory_space<smem>>, %arg3: memref<16xi32, #tpu.memory_space<smem>>) -> (i32, i32) {
    %c0_i32 = arith.constant 0 : i32
    %c0_i32_0 = arith.constant 0 : i32
    %c0_i32_1 = arith.constant 0 : i32
    return %c0_i32, %c0_i32_0 : i32, i32
  }
  func.func @transform_11(%arg0: i32, %arg1: i32, %arg2: memref<16xi32, #tpu.memory_space<smem>>, %arg3: memref<16xi32, #tpu.memory_space<smem>>) -> (i32, i32) {
    %c0_i32 = arith.constant 0 : i32
    %c0_i32_0 = arith.constant 0 : i32
    return %arg0, %c0_i32 : i32, i32
  }
  func.func @transform_12(%arg0: i32, %arg1: i32, %arg2: memref<16xi32, #tpu.memory_space<smem>>, %arg3: memref<16xi32, #tpu.memory_space<smem>>) -> (i32, i32) {
    %c0_i32 = arith.constant 0 : i32
    %c0_i32_0 = arith.constant 0 : i32
    return %arg0, %c0_i32 : i32, i32
  }
}

</mosaic_0001>

<bundles_post_ra>
// kernel: tpu_custom_call.1
= control target key start
LH: loop header
LB: loop body
LE: loop exit
PB: predicated region body
PF: predicated region fallthrough
CT: control target
= control target key end

     0   :  { %s2425_s0 = inlined_call_operand.vmem [shape: s32[16], index: 0, kind: input, shape index: {}]   ;;  %s2426_s2 = inlined_call_operand.vmem [shape: f32[6,8,8], index: 2, kind: input, shape index: {}]   ;;  %s2427_s3 = inlined_call_operand.vmem [shape: f32[2,6], index: 3, kind: input, shape index: {}]   ;;  %s2428_s4 = inlined_call_operand.vmem [shape: f32[6,2], index: 4, kind: input, shape index: {}]   ;;  %s2429_s5 = inlined_call_operand.vmem [shape: f32[1,128,128], index: 5, kind: input, shape index: {}]   ;;  %s2430_s6 = inlined_call_operand.vmem [shape: f32[128,32], index: 6, kind: input, shape index: {}]   ;;  %s2431_s7 = inlined_call_operand.vmem [shape: f32[128,32], index: 7, kind: input, shape index: {}]   ;;  %s2432_s8 = inlined_call_operand.vmem [shape: f32[1,32], index: 8, kind: input, shape index: {}]   ;;  %s2433_s9 = inlined_call_operand.vmem [shape: f32[32,16], index: 9, kind: input, shape index: {}]   ;;  %s2434_s10 = inlined_call_operand.vmem [shape: f32[1,16], index: 10, kind: input, shape index: {}]   ;;  %s2435_s11 = inlined_call_operand.vmem [shape: f32[16,1], index: 11, kind: input, shape index: {}]   ;;  %s2436_s13 = inlined_call_operand.vmem [shape: f32[8,1], index: 13, kind: input, shape index: {}]   ;;  %s2437_s14 = inlined_call_operand.vmem [shape: f32[8,1], index: 14, kind: output, shape index: {}]   ;;  %s2438_s1 = inlined_call_operand.vmem [shape: s32[16], index: 1, kind: input, shape index: {}]   ;;  %s2439_s12 = inlined_call_operand.<no memory space> [shape: f32[1,1], index: 12, kind: input, shape index: {}]  }
   0x1   :  { %s19_s15 = sshll.u32 %s2425_s0, 4  ;;  %s23_s18 = sshll.u32 %s2438_s1, 4  ;;  %v27_v0 = vstv %s2439_s12  ;;  %s20_s15 = int_to_ptr.vmem [resolvable:$true] %s19_s15  ;;  %s24_s18 = int_to_ptr.vmem [resolvable:$true] %s23_s18 }
   0x2   :  { %28 = vst [vmem:[#allocation7] sm:$0x1] %v27_v0  ;;  %s1828_s21 = scalar_lea.vmem %s20_s15, 16  ;;  %p1833_p1 = scmp.lt.s32.totalorder %s20_s15, %s20_s15 }
   0x3   :  { %p1829_p0 = scmp.ne.s32.totalorder %s20_s15, %s1828_s21  ;;  %p1834_p2 = scmp.lt.s32.totalorder %s1828_s21, %s1828_s21 }
   0x5   :  { %p1835_p3 = por %p1834_p2, %p1833_p1 }
   0x7   :  { %p1836_p4 = pnand %p1835_p3, %p1829_p0 }
   0x9   :  { %1839 = shalt.err (!%p1836_p4)  }
   0xa   :  { %s1854_s22 = smov [#allocation5]   ;;  %s1840_s0 = scalar_lea.vmem %s24_s18, 16 }
   0xb   :  { %22 = dma.vmem_to_smem %s20_s15, 16, %s1854_s22, [#allocation4] }
   0xc   :  { %p1841_p5 = scmp.ne.s32.totalorder %s24_s18, %s1840_s0  ;;  %p1845_p6 = scmp.lt.s32.totalorder %s24_s18, %s24_s18 }
   0xd   :  { %p1846_p7 = scmp.lt.s32.totalorder %s1840_s0, %s1840_s0 }
   0xf   :  { %p1847_p8 = por %p1846_p7, %p1845_p6 }
  0x11   :  { %p1848_p9 = pnand %p1847_p8, %p1841_p5 }
  0x13   :  { %1851 = shalt.err (!%p1848_p9)  }
  0x14   :  { %s1855_s1 = smov [#allocation6]  }
  0x15   :  { %26 = dma.vmem_to_smem %s24_s18, 16, %s1855_s1, [#allocation4] }
  0x16   :  { %1852 = dma.done.wait [#allocation4], 32 }
  0x17   :  { %1853 = vsyncadd [#allocation4], 4294967264 }
  0x18   :  { %30 = sfence }
  0x19   :  { %v1961_v1 = vld [vmem:[%s2426_s2] sm:$0xff]  ;;  %vm65_vm0 = vcmask 64512   ;;  %v1966_v2 = vld [vmem:[%s2426_s2 + $0x10] sm:$0xff]  ;;  %v1971_v3 = vld [vmem:[%s2426_s2 + $0x8] sm:$0xff]  ;;  %v1856_v13 = vmov 0.0   ;;  %vm1857_vm1 = vmmov 0   ;;  %v98_v14 = vlaneseq }
  0x1a   :  { %v66_v4 = vsel %vm65_vm0, %v1961_v1, 0.0  ;;  %292 = vst.msk [vmem:[#allocation2] sm:$0xff] %vm65_vm0, %v1961_v1  ;;  %v72_v5 = vsel %vm65_vm0, %v1966_v2, 0.0  ;;  %294 = vst.msk [vmem:[#allocation2 + $0x20] sm:$0xff] %vm65_vm0, %v1966_v2  ;;  %v1986_v6 = vld [vmem:[%s2426_s2 + $0x18] sm:$0xff]  ;;  %v1991_v7 = vld [vmem:[%s2426_s2 + $0x20] sm:$0xff]  ;;  %1507 = vmatprep.subr.mxu1 %v1856_v13  ;;  %1509 = vmatprep.mubr.msk.f32.mxu1 %vm1857_vm1, %v1856_v13 }
  0x1b   :  { %293 = vst.msk [vmem:[#allocation2 + $0x10] sm:$0xff] %vm65_vm0, %v1971_v3  ;;  %v1996_v8 = vld [vmem:[%s2426_s2 + $0x28] sm:$0xff]  ;;  %67 = vadd.xlane.f32.xlu0 %v66_v4  ;;  %73 = vadd.xlane.f32.xlu1 %v72_v5  ;;  %295 = vst.msk [vmem:[#allocation2 + $0x30] sm:$0xff] %vm65_vm0, %v1986_v6  ;;  %v69_v9 = vsel %vm65_vm0, %v1971_v3, 0.0  ;;  %v75_v10 = vsel %vm65_vm0, %v1986_v6, 0.0  ;;  %v78_v11 = vsel %vm65_vm0, %v1991_v7, 0.0 }
  0x1c   :  { %296 = vst.msk [vmem:[#allocation2 + $0x40] sm:$0xff] %vm65_vm0, %v1991_v7  ;;  %297 = vst.msk [vmem:[#allocation2 + $0x50] sm:$0xff] %vm65_vm0, %v1996_v8  ;;  %v81_v12 = vsel %vm65_vm0, %v1996_v8, 0.0  ;;  %v99_v15 = vand.u32 127, %v98_v14  ;;  %v2015_v16 = vshrl.u32 %v98_v14, 7  ;;  %vm124_vm2 = vcmask 1041409  }
  0x1d   :  { %vm126_vm3 = vcmask 1042434   ;;  %vm128_vm4 = vcmask 1043459   ;;  %vm130_vm5 = vcmask 1044484   ;;  %vm132_vm6 = vcmask 1045509   ;;  %v91_v40 = vld [vmem:[%s2427_s3] sm:$0x3] }
  0x1e   :  { %v102_v19 = vsub.s32 %v99_v15, %v2015_v16  ;;  %vm138_vm7 = vcmask 1045504   ;;  %vm134_vm8 = vcmask 48128   ;;  %vm217_vm9 = vcmask 1041408   ;;  %v212_v45 = vld [vmem:[%s2428_s4] sm:$0x3f]  ;;  %s2043_s3 = sld [smem:[#allocation5 + $0x2]] }
  0x1f   :  { %70 = vadd.xlane.f32.xlu0 %v69_v9  ;;  %76 = vadd.xlane.f32.xlu1 %v75_v10  ;;  %vm213_vm10 = vcmask 15360   ;;  %v307_v46 = vsub.s32 1, %v2015_v16  ;;  %v300_v47 = vsub.s32 0, %v2015_v16  ;;  %v314_v53 = vsub.s32 2, %v2015_v16  ;;  %s2045_s4 = sld [smem:[#allocation5 + $0x1]]  ;;  %s2048_s21 = sld [smem:[#allocation5 + $0x4]] }
  0x20   :  { %v328_v54 = vsub.s32 4, %v2015_v16  ;;  %v321_v57 = vsub.s32 3, %v2015_v16  ;;  %v335_v59 = vsub.s32 5, %v2015_v16  ;;  %s2051_s22 = sld [smem:[#allocation5 + $0x3]]  ;;  %s2054_s0 = sld [smem:[#allocation5 + $0x6]]  ;;  %v848_v14 = vld [vmem:[%s2429_s5 + $0x18] sm:$0xff] }
  0x21   :  { %s2058_s12 = sld [smem:[#allocation5 + $0x5]]  ;;  %s2067_s28 = sld [smem:[#allocation5 + $0x8]]  ;;  %vm352_vm11 = vcmask 261120   ;;  %vm573_vm12 = vcmask 130048   ;;  %vm576_vm13 = vcmask 195584   ;;  %vm582_vm14 = vcmask 326656  }
  0x22   :  { %s2069_s29 = sld [smem:[#allocation5 + $0x7]]  ;;  %s2071_s30 = sld [smem:[#allocation5 + $0xa]]  ;;  %353 = vst.msk [vmem:[#allocation3] sm:$0xff] %vm352_vm11, %v1856_v13  ;;  %vm585_vm15 = vcmask 392192  }
  0x23   :  { %79 = vadd.xlane.f32.xlu0 %v78_v11  ;;  %82 = vadd.xlane.f32.xlu1 %v81_v12  ;;  %v846_v11 = vld [vmem:[%s2429_s5 + $0x8] sm:$0xff]  ;;  %s2081_s20 = sld [smem:[#allocation5 + $0x9]]  ;;  %s1858_s26 = smov 16  }
  0x24   :  { %s1379_s1 = sshll.u32 %s2043_s3, 4  ;;  %s2083_s3 = sld [smem:[#allocation5 + $0xc]] }
  0x25   :  { %s1377_s27 = sshll.u32 %s2045_s4, 4  ;;  %s1383_s15 = sshll.u32 %s2048_s21, 4 }
  0x26   :  { %s1381_s16 = sshll.u32 %s2051_s22, 4  ;;  %s369_s4 = scalar_lea.vmem [#allocation2], %s1379_s1 }
  0x27   :  { %s363_s21 = scalar_lea.vmem [#allocation2], %s1377_s27  ;;  %s1387_s22 = sshll.u32 %s2054_s0, 4 }
  0x28   :  { %s1385_s23 = sshll.u32 %s2058_s12, 4  ;;  %s381_s24 = scalar_lea.vmem [#allocation2], %s1383_s15 }
  0x29   :  { %s1391_s25 = sshll.u32 %s2067_s28, 4  ;;  %s375_s1 = scalar_lea.vmem [#allocation2], %s1381_s16 }
  0x2a   :  { %s1389_s0 = sshll.u32 %s2069_s29, 4  ;;  %s1859_s27 = smov 8  }
  0x2b   :  { %s2093_s17 = sld [smem:[#allocation5 + $0xb]]  ;;  %s393_s12 = scalar_lea.vmem [#allocation2], %s1387_s22 }
  0x2c   :  { %s1860_s28 = smov 32   ;;  %s387_s15 = scalar_lea.vmem [#allocation2], %s1385_s23 }
  0x2d   :  { %s1395_s16 = sshll.u32 %s2071_s30, 4  ;;  %s1393_s2 = sshll.u32 %s2081_s20, 4 }
  0x2e   :  { %s1861_s29 = smov 24   ;;  %s2099_s18 = sld [smem:[#allocation5 + $0xe]] }
  0x2f   :  { %s2101_s19 = sld [smem:[#allocation5 + $0xd]]  ;;  %s399_s22 = scalar_lea.vmem [#allocation2], %s1389_s0 }
  0x30   :  { %s1399_s30 = sshll.u32 %s2083_s3, 4  ;;  %s1863_s20 = smov 40  }
  0x31   :  { %s1397_s23 = sshll.u32 %s2093_s17, 4  ;;  %s411_s0 = scalar_lea.vmem [#allocation2], %s1393_s2 }
  0x32   :  { %s2442_s3 = smov 56   ;;  %s1867_s2 = smov 72  }
  0x34   :  { %s1403_s17 = sshll.u32 %s2099_s18, 4  ;;  %s2133_s18 = sld [smem:[#allocation6 + $0x3]] }
  0xa8   :  { %v68_v17 = vpop.xlane.xlu0 %67  ;;  %v74_v18 = vpop.xlane.xlu1 %73 }
  0xa9   :  { %v85_v20 = vmul.f32 0.125, %v68_v17  ;;  %v87_v21 = vmul.f32 0.125, %v74_v18 }
  0xab   :  { %v103_v26 = vrot.slane %v85_v20, %v102_v19  ;;  %v111_v29 = vrot.slane %v87_v21, %v102_v19 }
  0xac   :  { %v71_v22 = vpop.xlane.xlu0 %70  ;;  %v77_v23 = vpop.xlane.xlu1 %76 }
  0xad   :  { %v86_v24 = vmul.f32 0.125, %v71_v22  ;;  %v88_v25 = vmul.f32 0.125, %v77_v23 }
  0xaf   :  { %v107_v27 = vrot.slane %v86_v24, %v102_v19  ;;  %v115_v28 = vrot.slane %v88_v25, %v102_v19 }
  0xb0   :  { %v80_v30 = vpop.xlane.xlu0 %79  ;;  %v83_v31 = vpop.xlane.xlu1 %82 }
  0xb1   :  { %v125_v32 = vsel %vm124_vm2, %v107_v27, %v103_v26  ;;  %v89_v33 = vmul.f32 0.125, %v80_v30  ;;  %v90_v34 = vmul.f32 0.125, %v83_v31  ;;  %vm588_vm2 = vcmask 457728  }
  0xb2   :  { %v127_v35 = vsel %vm126_vm3, %v111_v29, %v125_v32  ;;  %vm591_vm3 = vcmask 523264  }
  0xb3   :  { %v119_v36 = vrot.slane %v89_v33, %v102_v19  ;;  %v123_v37 = vrot.slane %v90_v34, %v102_v19  ;;  %v129_v38 = vsel %vm128_vm4, %v115_v28, %v127_v35  ;;  %vm594_vm4 = vcmask 588800  }
  0xb5   :  { %v131_v39 = vsel %vm130_vm5, %v119_v36, %v129_v38  ;;  %vm597_vm5 = vcmask 654336  }
  0xb6   :  { %v133_v41 = vsel %vm132_vm6, %v123_v37, %v131_v39  ;;  %vm600_vm6 = vcmask 719872  }
  0xb7   :  { %1508 = vmatpush3.msk.msra.mxu1 %vm138_vm7, %v133_v41  ;;  %vm603_vm7 = vcmask 785408  }
  0xb8   :  { %1510 = vmatmul.mubr.msk.f32.vlgmr.msra.gmra.mrb[0].mxu1 %vm134_vm8, %v91_v40  ;;  %1512 = vmatprep.subr.mxu1 %v1856_v13  ;;  %vm606_vm8 = vcmask 850944  }
  0xb9   :  { %1514 = vmatprep.mubr.msk.f32.mxu1 %vm1857_vm1, %v1856_v13 }
 0x18b   :  { %v207_v42 = vpop.f32.mrb[0].mxu1 }
 0x18c   :  { %v211_v43 = vmax.f32 %v207_v42, 0.0  ;;  %v1511_v44 = vpop.f32.mrb[1].mxu1 }
 0x18e   :  { %1513 = vmatpush3.msk.msra.mxu1 %vm217_vm9, %v211_v43  ;;  %vm609_vm9 = vcmask 916480  }
 0x18f   :  { %1515 = vmatmul.mubr.msk.f32.vlgmr.msra.gmra.mrb[2].mxu1 %vm213_vm10, %v212_v45  ;;  %vm612_vm10 = vcmask 982016  }
 0x190   :  { %1584 = vmatprep.mubr.msk.f32.mxu1 %vm1857_vm1, %v1856_v13 }
 0x262   :  { %v287_v48 = vpop.f32.mrb[2].mxu1 }
 0x263   :  { %v291_v49 = vmax.f32 %v287_v48, 0.0  ;;  %v1516_v50 = vpop.f32.mrb[3].mxu1 }
 0x264   :  { %v849_v50 = vld [vmem:[%s2429_s5 + $0x20] sm:$0xff] }
 0x265   :  { %v308_v51 = vrot.slane %v291_v49, %v307_v46  ;;  %v301_v52 = vrot.slane %v291_v49, %v300_v47  ;;  %v315_v55 = vrot.slane %v291_v49, %v314_v53  ;;  %v329_v56 = vrot.slane %v291_v49, %v328_v54  ;;  %v851_v53 = vld [vmem:[%s2429_s5 + $0x30] sm:$0xff]  ;;  %v852_v54 = vld [vmem:[%s2429_s5 + $0x38] sm:$0xff] }
 0x266   :  { %v322_v58 = vrot.slane %v291_v49, %v321_v57  ;;  %v336_v60 = vrot.slane %v291_v49, %v335_v59 }
 0x267   :  { %310 = vbcast.lane.b32.xlu1 %v308_v51, 256  ;;  %303 = vbcast.lane.b32.xlu0 %v301_v52, 256  ;;  %v850_v52 = vld [vmem:[%s2429_s5 + $0x28] sm:$0xff] }
 0x268   :  { %v1648_v59 = vpack.c.bf16 %v850_v52, %v849_v50  ;;  %v960_v50 = vld [vmem:[%s2431_s7 + $0x28] sm:$0xff] }
 0x26b   :  { %317 = vbcast.lane.b32.xlu1 %v315_v55, 256  ;;  %331 = vbcast.lane.b32.xlu0 %v329_v56, 256 }
 0x26f   :  { %324 = vbcast.lane.b32.xlu1 %v322_v58, 256 }
 0x273   :  { %338 = vbcast.lane.b32.xlu1 %v336_v60, 256  ;;  %v1652_v60 = vpack.c.bf16 %v852_v54, %v851_v53  ;;  %v961_v54 = vld [vmem:[%s2431_s7 + $0x30] sm:$0xff] }
 0x2d9   :  { %v311_v61 = vpop.permute.xlu1 %310  ;;  %v304_v62 = vpop.permute.xlu0 %303 }
 0x2da   :  { %v341_v63 = vmul.f32 %v311_v61, %v1971_v3  ;;  %v340_v0 = vmul.f32 %v304_v62, %v1961_v1  ;;  %v853_v62 = vld [vmem:[%s2429_s5 + $0x40] sm:$0xff] }
 0x2dc   :  { %347 = vst.msk [vmem:[#allocation2 + $0x18] sm:$0xff] %vm65_vm0, %v341_v63  ;;  %346 = vst.msk [vmem:[#allocation2 + $0x8] sm:$0xff] %vm65_vm0, %v340_v0  ;;  %v854_v63 = vld [vmem:[%s2429_s5 + $0x48] sm:$0xff] }
 0x2dd   :  { %v318_v4 = vpop.permute.xlu1 %317  ;;  %v332_v5 = vpop.permute.xlu0 %331 }
 0x2de   :  { %v342_v9 = vmul.f32 %v318_v4, %v1966_v2  ;;  %v344_v10 = vmul.f32 %v332_v5, %v1991_v7 }
 0x2e0   :  { %348 = vst.msk [vmem:[#allocation2 + $0x28] sm:$0xff] %vm65_vm0, %v342_v9  ;;  %350 = vst.msk [vmem:[#allocation2 + $0x48] sm:$0xff] %vm65_vm0, %v344_v10  ;;  %v1656_v9 = vpack.c.bf16 %v854_v63, %v853_v62  ;;  %v965_v62 = vld [vmem:[%s2431_s7 + $0x50] sm:$0xff]  ;;  %v966_v63 = vld [vmem:[%s2431_s7 + $0x58] sm:$0xff] }
 0x2e1   :  { %v325_v3 = vpop.permute.xlu1 %324 }
 0x2e2   :  { %v343_v1 = vmul.f32 %v325_v3, %v1986_v6  ;;  %v845_v6 = vld [vmem:[%s2429_s5] sm:$0xff]  ;;  %v855_v3 = vld [vmem:[%s2429_s5 + $0x50] sm:$0xff] }
 0x2e3   :  { %v1640_v12 = vpack.c.bf16 %v846_v11, %v845_v6  ;;  %v857_v11 = vld [vmem:[%s2429_s5 + $0x60] sm:$0xff] }
 0x2e4   :  { %349 = vst.msk [vmem:[#allocation2 + $0x38] sm:$0xff] %vm65_vm0, %v343_v1  ;;  %v856_v1 = vld [vmem:[%s2429_s5 + $0x58] sm:$0xff] }
 0x2e5   :  { %v339_v2 = vpop.permute.xlu1 %338  ;;  %1641 = vmatprep.subr.bf16.mxu0 %v1640_v12  ;;  %v1660_v6 = vpack.c.bf16 %v856_v1, %v855_v3 }
 0x2e6   :  { %v345_v7 = vmul.f32 %v339_v2, %v1996_v8  ;;  %1643 = vmatpush3.bf16.msra.mxu0 %v1640_v12  ;;  %v847_v8 = vld [vmem:[%s2429_s5 + $0x10] sm:$0xff]  ;;  %v858_v12 = vld [vmem:[%s2429_s5 + $0x68] sm:$0xff] }
 0x2e7   :  { %v1644_v15 = vpack.c.bf16 %v848_v14, %v847_v8  ;;  %v1664_v14 = vpack.c.bf16 %v858_v12, %v857_v11 }
 0x2e8   :  { %351 = vst.msk [vmem:[#allocation2 + $0x58] sm:$0xff] %vm65_vm0, %v345_v7 }
 0x2e9   :  { %1645 = vmatprep.subr.bf16.mxu0 %v1644_v15 }
 0x2ea   :  { %1647 = vmatpush3.bf16.msra.mxu0 %v1644_v15 }
 0x2eb   :  { %1649 = vmatprep.subr.bf16.mxu0 %v1648_v59 }
 0x2ee   :  { %1651 = vmatpush3.bf16.msra.mxu0 %v1648_v59  ;;  %v964_v59 = vld [vmem:[%s2431_s7 + $0x48] sm:$0xff] }
 0x2ef   :  { %v370_v16 = vld [vmem:[%s369_s4] sm:$0xff]  ;;  %v371_v17 = vld [vmem:[%s369_s4 + $0x8] sm:$0xff]  ;;  %s405_s4 = scalar_lea.vmem [#allocation2], %s1391_s25  ;;  %s417_s25 = scalar_lea.vmem [#allocation2], %s1395_s16  ;;  %1653 = vmatprep.subr.bf16.mxu0 %v1652_v60 }
 0x2f0   :  { %v364_v18 = vld [vmem:[%s363_s21] sm:$0xff]  ;;  %v1754_v19 = vpack.i.bf16 %v371_v17, %v370_v16  ;;  %v365_v20 = vld [vmem:[%s363_s21 + $0x8] sm:$0xff]  ;;  %s1862_s21 = smov 48   ;;  %s2115_s16 = sld [smem:[#allocation6 + $0x2]]  ;;  %v859_v16 = vld [vmem:[%s2429_s5 + $0x70] sm:$0xff] }
 0x2f1   :  { %v1749_v21 = vpack.i.bf16 %v365_v20, %v364_v18  ;;  %v382_v22 = vld [vmem:[%s381_s24] sm:$0xff]  ;;  %v383_v23 = vld [vmem:[%s381_s24 + $0x8] sm:$0xff]  ;;  %s2107_s24 = sld [smem:[#allocation5 + $0xf]]  ;;  %v860_v17 = vld [vmem:[%s2429_s5 + $0x78] sm:$0xff] }
 0x2f2   :  { %1755 = vrot.lane.b32.xlu1 %v1754_v19, %s1858_s26  ;;  %v376_v24 = vld [vmem:[%s375_s1] sm:$0xff]  ;;  %v377_v25 = vld [vmem:[%s375_s1 + $0x8] sm:$0xff]  ;;  %v1764_v26 = vpack.i.bf16 %v383_v23, %v382_v22  ;;  %s2109_s1 = sld [smem:[#allocation6 + $0x1]]  ;;  %1655 = vmatpush3.bf16.msra.mxu0 %v1652_v60  ;;  %v1668_v19 = vpack.c.bf16 %v860_v17, %v859_v16 }
 0x2f3   :  { %1750 = vrot.lane.b32.xlu0 %v1749_v21, %s1859_s27  ;;  %v1759_v27 = vpack.i.bf16 %v377_v25, %v376_v24  ;;  %v394_v28 = vld [vmem:[%s393_s12] sm:$0xff]  ;;  %v395_v29 = vld [vmem:[%s393_s12 + $0x8] sm:$0xff]  ;;  %s2440_s12 = smov 64   ;;  %1657 = vmatprep.subr.bf16.mxu0 %v1656_v9 }
 0x2f4   :  { %v388_v30 = vld [vmem:[%s387_s15] sm:$0xff]  ;;  %v389_v31 = vld [vmem:[%s387_s15 + $0x8] sm:$0xff]  ;;  %v1774_v32 = vpack.i.bf16 %v395_v29, %v394_v28  ;;  %s1401_s15 = sshll.u32 %s2101_s19, 4  ;;  %s1412_s19 = sshll.u32 %s2133_s18, 4 }
 0x2f5   :  { %v1769_v33 = vpack.i.bf16 %v389_v31, %v388_v30  ;;  %v406_v34 = vld [vmem:[%s405_s4] sm:$0xff]  ;;  %v407_v35 = vld [vmem:[%s405_s4 + $0x8] sm:$0xff]  ;;  %s429_s4 = scalar_lea.vmem [#allocation2], %s1399_s30 }
 0x2f6   :  { %1765 = vrot.lane.b32.xlu1 %v1764_v26, %s1860_s28  ;;  %v400_v36 = vld [vmem:[%s399_s22] sm:$0xff]  ;;  %v401_v37 = vld [vmem:[%s399_s22 + $0x8] sm:$0xff]  ;;  %v1784_v38 = vpack.i.bf16 %v407_v35, %v406_v34  ;;  %s2444_s22 = smov 80   ;;  %1659 = vmatpush3.bf16.msra.mxu0 %v1656_v9 }
 0x2f7   :  { %1760 = vrot.lane.b32.xlu0 %v1759_v27, %s1861_s29  ;;  %v1779_v39 = vpack.i.bf16 %v401_v37, %v400_v36  ;;  %v418_v40 = vld [vmem:[%s417_s25] sm:$0xff]  ;;  %v419_v41 = vld [vmem:[%s417_s25 + $0x8] sm:$0xff]  ;;  %s423_s25 = scalar_lea.vmem [#allocation2], %s1397_s23  ;;  %s2446_s23 = smov 112   ;;  %1661 = vmatprep.subr.bf16.mxu0 %v1660_v6 }
 0x2f8   :  { %v412_v42 = vld [vmem:[%s411_s0] sm:$0xff]  ;;  %v413_v43 = vld [vmem:[%s411_s0 + $0x8] sm:$0xff]  ;;  %v1794_v44 = vpack.i.bf16 %v419_v41, %v418_v40  ;;  %s1405_s0 = sshll.u32 %s2107_s24, 4  ;;  %s441_s24 = scalar_lea.vmem [#allocation2], %s1403_s17 }
 0x2f9   :  { %v1789_v45 = vpack.i.bf16 %v413_v43, %v412_v42  ;;  %v430_v46 = vld [vmem:[%s429_s4] sm:$0xff]  ;;  %v431_v47 = vld [vmem:[%s429_s4 + $0x8] sm:$0xff]  ;;  %s1869_s17 = smov 88   ;;  %s447_s4 = scalar_lea.vmem [#allocation2], %s1405_s0  ;;  %v1873_v43 = vmov 0.0|0.0  }
 0x2fa   :  { %1775 = vrot.lane.b32.xlu1 %v1774_v32, %s1862_s21  ;;  %v424_v48 = vld [vmem:[%s423_s25] sm:$0xff]  ;;  %v425_v49 = vld [vmem:[%s423_s25 + $0x8] sm:$0xff]  ;;  %v1804_v51 = vpack.i.bf16 %v431_v47, %v430_v46  ;;  %s1868_s25 = smov 96   ;;  %s1410_s0 = sshll.u32 %s2115_s16, 4  ;;  %1663 = vmatpush3.bf16.msra.mxu0 %v1660_v6  ;;  %v958_v46 = vld [vmem:[%s2431_s7 + $0x18] sm:$0xff] }
 0x2fb   :  { %1770 = vrot.lane.b32.xlu0 %v1769_v33, %s1863_s20  ;;  %v1799_v55 = vpack.i.bf16 %v425_v49, %v424_v48  ;;  %v442_v56 = vld [vmem:[%s441_s24] sm:$0xff]  ;;  %v443_v57 = vld [vmem:[%s441_s24 + $0x8] sm:$0xff]  ;;  %s2448_s16 = smov 120   ;;  %1665 = vmatprep.subr.bf16.mxu0 %v1664_v14 }
 0x2fc   :  { %v1814_v0 = vpack.i.bf16 %v443_v57, %v442_v56  ;;  %v448_v5 = vld [vmem:[%s447_s4] sm:$0xff]  ;;  %v449_v10 = vld [vmem:[%s447_s4 + $0x8] sm:$0xff]  ;;  %s1419_s4 = sld [smem:[#allocation6 + $0x7]]  ;;  %1672 = vmatprep.subr.bf16.mxu1 %v1873_v43 }
 0x2fd   :  { %v1819_v7 = vpack.i.bf16 %v449_v10, %v448_v5  ;;  %v955_v40 = vld [vmem:[%s2431_s7] sm:$0xff]  ;;  %v956_v41 = vld [vmem:[%s2431_s7 + $0x8] sm:$0xff] }
 0x2fe   :  { %1785 = vrot.lane.b32.xlu1 %v1784_v38, %s2440_s12  ;;  %s435_s12 = scalar_lea.vmem [#allocation2], %s1401_s15  ;;  %s1408_s15 = sshll.u32 %s2109_s1, 4  ;;  %1667 = vmatpush3.bf16.msra.mxu0 %v1664_v14  ;;  %v959_v49 = vld [vmem:[%s2431_s7 + $0x20] sm:$0xff]  ;;  %v968_v5 = vld [vmem:[%s2431_s7 + $0x68] sm:$0xff] }
 0x2ff   :  { %1780 = vrot.lane.b32.xlu0 %v1779_v39, %s2442_s3  ;;  %v436_v58 = vld [vmem:[%s435_s12] sm:$0xff]  ;;  %v437_v61 = vld [vmem:[%s435_s12 + $0x8] sm:$0xff]  ;;  %s1871_s1 = smov 104   ;;  %s622_s30 = scalar_lea.vmem [#allocation2], %s1408_s15  ;;  %1669 = vmatprep.subr.bf16.mxu0 %v1668_v19  ;;  %v1679_v52 = vpack.c.bf16 %v960_v50, %v959_v49 }
 0x300   :  { %v1809_v4 = vpack.i.bf16 %v437_v61, %v436_v58  ;;  %v623_v2 = vld [vmem:[%s622_s30] sm:$0xff]  ;;  %s2163_s15 = sld [smem:[#allocation6 + $0x5]]  ;;  %v624_v15 = vld [vmem:[%s622_s30 + $0x8] sm:$0xff]  ;;  %s2450_s12 = smov 56  }
 0x301   :  { %v963_v58 = vld [vmem:[%s2431_s7 + $0x40] sm:$0xff] }
 0x302   :  { %1795 = vrot.lane.b32.xlu1 %v1794_v44, %s2444_s22  ;;  %s2152_s22 = sld [smem:[#allocation6 + $0x4]]  ;;  %1671 = vmatpush3.bf16.msra.mxu0 %v1668_v19  ;;  %v1673_v44 = vpack.c.bf16 %v956_v41, %v955_v40  ;;  %v1685_v61 = vpack.c.bf16 %v964_v59, %v963_v58 }
 0x303   :  { %1790 = vrot.lane.b32.xlu0 %v1789_v45, %s1867_s2  ;;  %v957_v45 = vld [vmem:[%s2431_s7 + $0x10] sm:$0xff]  ;;  %1696 = vmatprep.subr.bf16.mxu0 %v1873_v43 }
 0x304   :  { %1674 = vmatpush3.bf16.msra.mxu1 %v1673_v44  ;;  %v1676_v47 = vpack.c.bf16 %v958_v46, %v957_v45 }
 0x305   :  { %1675 = vmatprep.subr.bf16.mxu1 %v1873_v43 }
 0x306   :  { %1805 = vrot.lane.b32.xlu1 %v1804_v51, %s1868_s25  ;;  %s1416_s30 = sshll.u32 %s2163_s15, 4 }
 0x307   :  { %1800 = vrot.lane.b32.xlu0 %v1799_v55, %s1869_s17  ;;  %v962_v55 = vld [vmem:[%s2431_s7 + $0x38] sm:$0xff] }
 0x308   :  { %s1414_s18 = sshll.u32 %s2152_s22, 4  ;;  %s642_s22 = scalar_lea.vmem [#allocation2], %s1416_s30  ;;  %1677 = vmatpush3.bf16.msra.mxu1 %v1676_v47  ;;  %v1682_v57 = vpack.c.bf16 %v962_v55, %v961_v54 }
 0x309   :  { %s637_s24 = scalar_lea.vmem [#allocation2], %s1414_s18  ;;  %v643_v23 = vld [vmem:[%s642_s22] sm:$0xff]  ;;  %v644_v26 = vld [vmem:[%s642_s22 + $0x8] sm:$0xff]  ;;  %1678 = vmatprep.subr.bf16.mxu1 %v1873_v43 }
 0x30a   :  { %1815 = vrot.lane.b32.xlu1 %v1814_v0, %s2446_s23  ;;  %s627_s23 = scalar_lea.vmem [#allocation2], %s1410_s0  ;;  %s632_s0 = scalar_lea.vmem [#allocation2], %s1412_s19  ;;  %v638_v21 = vld [vmem:[%s637_s24] sm:$0xff]  ;;  %v639_v24 = vld [vmem:[%s637_s24 + $0x8] sm:$0xff]  ;;  %v1688_v0 = vpack.c.bf16 %v966_v63, %v965_v62 }
 0x30b   :  { %1810 = vrot.lane.b32.xlu0 %v1809_v4, %s1871_s1  ;;  %v628_v8 = vld [vmem:[%s627_s23] sm:$0xff]  ;;  %v629_v20 = vld [vmem:[%s627_s23 + $0x8] sm:$0xff]  ;;  %s1423_s23 = sld [smem:[#allocation6 + $0x9]] }
 0x30c   :  { %v633_v18 = vld [vmem:[%s632_s0] sm:$0xff]  ;;  %v634_v22 = vld [vmem:[%s632_s0 + $0x8] sm:$0xff]  ;;  %s2451_s0 = smov 64   ;;  %1680 = vmatpush3.bf16.msra.mxu1 %v1679_v52 }
 0x30d   :  { %1681 = vmatprep.subr.bf16.mxu1 %v1873_v43  ;;  %v967_v4 = vld [vmem:[%s2431_s7 + $0x60] sm:$0xff] }
 0x30e   :  { %697 = vrot.lane.b32.xlu1 %v623_v2, %s1859_s27  ;;  %v1691_v9 = vpack.c.bf16 %v968_v5, %v967_v4 }
 0x30f   :  { %1820 = vrot.lane.b32.xlu0 %v1819_v7, %s2448_s16  ;;  %s1417_s16 = sld [smem:[#allocation6 + $0x6]] }
 0x310   :  { %1683 = vmatpush3.bf16.msra.mxu1 %v1682_v57 }
 0x311   :  { %s1424_s3 = sshll.u32 %s1423_s23, 4  ;;  %1684 = vmatprep.subr.bf16.mxu1 %v1873_v43 }
 0x312   :  { %705 = vrot.lane.b32.xlu1 %v628_v8, %s1858_s26 }
 0x313   :  { %699 = vrot.lane.b32.xlu0 %v624_v15, %s1859_s27  ;;  %s1421_s27 = sld [smem:[#allocation6 + $0x8]] }
 0x314   :  { %1686 = vmatpush3.bf16.msra.mxu1 %v1685_v61 }
 0x315   :  { %s1418_s5 = sshll.u32 %s1417_s16, 4  ;;  %s1425_s16 = sld [smem:[#allocation6 + $0xa]]  ;;  %1687 = vmatprep.subr.bf16.mxu1 %v1873_v43 }
 0x316   :  { %713 = vrot.lane.b32.xlu1 %v633_v18, %s1861_s29  ;;  %s647_s19 = scalar_lea.vmem [#allocation2], %s1418_s5 }
 0x317   :  { %707 = vrot.lane.b32.xlu0 %v629_v20, %s1858_s26  ;;  %s1420_s26 = sshll.u32 %s1419_s4, 4  ;;  %v648_v25 = vld [vmem:[%s647_s19] sm:$0xff]  ;;  %v649_v28 = vld [vmem:[%s647_s19 + $0x8] sm:$0xff]  ;;  %s662_s4 = scalar_lea.vmem [#allocation2], %s1424_s3 }
 0x318   :  { %s652_s15 = scalar_lea.vmem [#allocation2], %s1420_s26  ;;  %v663_v31 = vld [vmem:[%s662_s4] sm:$0xff]  ;;  %v664_v34 = vld [vmem:[%s662_s4 + $0x8] sm:$0xff]  ;;  %s2191_s26 = sld [smem:[#allocation6 + $0xe]]  ;;  %1689 = vmatpush3.bf16.msra.mxu1 %v1688_v0 }
 0x319   :  { %v653_v27 = vld [vmem:[%s652_s15] sm:$0xff]  ;;  %v654_v30 = vld [vmem:[%s652_s15 + $0x8] sm:$0xff]  ;;  %1690 = vmatprep.subr.bf16.mxu1 %v1873_v43 }
 0x31a   :  { %721 = vrot.lane.b32.xlu1 %v638_v21, %s1860_s28 }
 0x31b   :  { %715 = vrot.lane.b32.xlu0 %v634_v22, %s1861_s29  ;;  %s1422_s29 = sshll.u32 %s1421_s27, 4  ;;  %s1426_s30 = sshll.u32 %s1425_s16, 4 }
 0x31c   :  { %s657_s18 = scalar_lea.vmem [#allocation2], %s1422_s29  ;;  %s667_s5 = scalar_lea.vmem [#allocation2], %s1426_s30  ;;  %1692 = vmatpush3.bf16.msra.mxu1 %v1691_v9 }
 0x31d   :  { %v658_v29 = vld [vmem:[%s657_s18] sm:$0xff]  ;;  %v659_v32 = vld [vmem:[%s657_s18 + $0x8] sm:$0xff]  ;;  %s2452_s27 = smov 80   ;;  %s2195_s29 = sld [smem:[#allocation6 + $0xf]]  ;;  %1693 = vmatprep.subr.bf16.mxu1 %v1873_v43 }
 0x31e   :  { %729 = vrot.lane.b32.xlu1 %v643_v23, %s1863_s20  ;;  %v668_v33 = vld [vmem:[%s667_s5] sm:$0xff]  ;;  %v669_v36 = vld [vmem:[%s667_s5 + $0x8] sm:$0xff] }
 0x31f   :  { %723 = vrot.lane.b32.xlu0 %v639_v24, %s1860_s28  ;;  %s1427_s28 = sld [smem:[#allocation6 + $0xb]] }
 0x322   :  { %737 = vrot.lane.b32.xlu1 %v648_v25, %s1862_s21 }
 0x323   :  { %731 = vrot.lane.b32.xlu0 %v644_v26, %s1863_s20  ;;  %s1429_s20 = sld [smem:[#allocation6 + $0xc]]  ;;  %s1436_s4 = sshll.u32 %s2195_s29, 4 }
 0x325   :  { %s1428_s24 = sshll.u32 %s1427_s28, 4 }
 0x326   :  { %745 = vrot.lane.b32.xlu1 %v653_v27, %s2450_s12  ;;  %s672_s23 = scalar_lea.vmem [#allocation2], %s1428_s24 }
 0x327   :  { %739 = vrot.lane.b32.xlu0 %v649_v28, %s1862_s21  ;;  %s1431_s21 = sld [smem:[#allocation6 + $0xd]]  ;;  %v673_v35 = vld [vmem:[%s672_s23] sm:$0xff]  ;;  %v674_v38 = vld [vmem:[%s672_s23 + $0x8] sm:$0xff] }
 0x329   :  { %s1430_s22 = sshll.u32 %s1429_s20, 4 }
 0x32a   :  { %753 = vrot.lane.b32.xlu1 %v658_v29, %s2451_s0  ;;  %s677_s16 = scalar_lea.vmem [#allocation2], %s1430_s22  ;;  %s2281_s22 = sld [smem:[#allocation6]] }
 0x32b   :  { %747 = vrot.lane.b32.xlu0 %v654_v30, %s2450_s12  ;;  %v678_v37 = vld [vmem:[%s677_s16] sm:$0xff]  ;;  %v679_v42 = vld [vmem:[%s677_s16 + $0x8] sm:$0xff] }
 0x32d   :  { %s1432_s19 = sshll.u32 %s1431_s21, 4  ;;  %s355_s21 = sld [smem:[#allocation5]] }
 0x32e   :  { %761 = vrot.lane.b32.xlu1 %v663_v31, %s1867_s2  ;;  %s682_s15 = scalar_lea.vmem [#allocation2], %s1432_s19 }
 0x32f   :  { %755 = vrot.lane.b32.xlu0 %v659_v32, %s2451_s0  ;;  %v683_v39 = vld [vmem:[%s682_s15] sm:$0xff]  ;;  %v684_v51 = vld [vmem:[%s682_s15 + $0x8] sm:$0xff] }
 0x330   :  { %s1406_s15 = sshll.u32 %s2281_s22, 4 }
 0x331   :  { %s617_s0 = scalar_lea.vmem [#allocation2], %s1406_s15 }
 0x332   :  { %769 = vrot.lane.b32.xlu1 %v668_v33, %s2452_s27 }
 0x333   :  { %763 = vrot.lane.b32.xlu0 %v664_v34, %s1867_s2  ;;  %s1434_s2 = sshll.u32 %s2191_s26, 4  ;;  %s2453_s26 = smov 112  }
 0x334   :  { %s687_s24 = scalar_lea.vmem [#allocation2], %s1434_s2  ;;  %s2454_s2 = smov 120  }
 0x335   :  { %v688_v48 = vld [vmem:[%s687_s24] sm:$0xff]  ;;  %v689_v56 = vld [vmem:[%s687_s24 + $0x8] sm:$0xff]  ;;  %s1375_s5 = sshll.u32 %s355_s21, 4 }
 0x336   :  { %777 = vrot.lane.b32.xlu1 %v673_v35, %s1869_s17 }
 0x337   :  { %771 = vrot.lane.b32.xlu0 %v669_v36, %s2452_s27  ;;  %s357_s27 = scalar_lea.vmem [#allocation2], %s1375_s5 }
 0x338   :  { %v358_v11 = vld [vmem:[%s357_s27] sm:$0xff]  ;;  %v359_v12 = vld [vmem:[%s357_s27 + $0x8] sm:$0xff] }
 0x33a   :  { %785 = vrot.lane.b32.xlu1 %v678_v37, %s1868_s25 }
 0x33b   :  { %779 = vrot.lane.b32.xlu0 %v674_v38, %s1869_s17 }
 0x33e   :  { %793 = vrot.lane.b32.xlu1 %v683_v39, %s1871_s1 }
 0x33f   :  { %787 = vrot.lane.b32.xlu0 %v679_v42, %s1868_s25  ;;  %s692_s25 = scalar_lea.vmem [#allocation2], %s1436_s4 }
 0x340   :  { %v693_v53 = vld [vmem:[%s692_s25] sm:$0xff]  ;;  %v694_v60 = vld [vmem:[%s692_s25 + $0x8] sm:$0xff] }
 0x342   :  { %801 = vrot.lane.b32.xlu1 %v688_v48, %s2453_s26 }
 0x343   :  { %795 = vrot.lane.b32.xlu0 %v684_v51, %s1871_s1 }
 0x346   :  { %809 = vrot.lane.b32.xlu1 %v693_v53, %s2454_s2 }
 0x347   :  { %803 = vrot.lane.b32.xlu0 %v689_v56, %s2453_s26 }
 0x34b   :  { %811 = vrot.lane.b32.xlu0 %v694_v60, %s2454_s2 }
 0x364   :  { %v1756_v10 = vpop.permute.xlu1 %1755 }
 0x365   :  { %v1751_v3 = vpop.permute.xlu0 %1750  ;;  %v1758_v7 = vunpack.i.h.bf16 %v1756_v10  ;;  %v1757_v6 = vunpack.i.l.bf16 %v1756_v10 }
 0x366   :  { %v1753_v1 = vunpack.i.h.bf16 %v1751_v3  ;;  %v1752_v2 = vunpack.i.l.bf16 %v1751_v3 }
 0x368   :  { %v571_v8 = vsel %vm65_vm0, %v358_v11, %v1752_v2  ;;  %v572_v14 = vsel %vm65_vm0, %v359_v12, %v1753_v1  ;;  %v1766_v15 = vpop.permute.xlu1 %1765 }
 0x369   :  { %v1761_v16 = vpop.permute.xlu0 %1760  ;;  %v1768_v19 = vunpack.i.h.bf16 %v1766_v15  ;;  %v1767_v20 = vunpack.i.l.bf16 %v1766_v15  ;;  %v574_v21 = vsel %vm573_vm12, %v571_v8, %v1757_v6  ;;  %v575_v22 = vsel %vm573_vm12, %v572_v14, %v1758_v7  ;;  %v939_v14 = vld [vmem:[%s2430_s6] sm:$0xff]  ;;  %v940_v15 = vld [vmem:[%s2430_s6 + $0x8] sm:$0xff] }
 0x36a   :  { %v1763_v17 = vunpack.i.h.bf16 %v1761_v16  ;;  %v1762_v18 = vunpack.i.l.bf16 %v1761_v16 }
 0x36c   :  { %v577_v23 = vsel %vm576_vm13, %v574_v21, %v1762_v18  ;;  %v578_v24 = vsel %vm576_vm13, %v575_v22, %v1763_v17  ;;  %v1776_v25 = vpop.permute.xlu1 %1775  ;;  %v1697_v21 = vpack.c.bf16 %v940_v15, %v939_v14 }
 0x36d   :  { %v1771_v26 = vpop.permute.xlu0 %1770  ;;  %v1778_v29 = vunpack.i.h.bf16 %v1776_v25  ;;  %v1777_v30 = vunpack.i.l.bf16 %v1776_v25  ;;  %v580_v31 = vsel %vm352_vm11, %v577_v23, %v1767_v20  ;;  %v581_v32 = vsel %vm352_vm11, %v578_v24, %v1768_v19  ;;  %v941_v25 = vld [vmem:[%s2430_s6 + $0x10] sm:$0xff] }
 0x36e   :  { %v1773_v27 = vunpack.i.h.bf16 %v1771_v26  ;;  %v1772_v28 = vunpack.i.l.bf16 %v1771_v26  ;;  %v942_v26 = vld [vmem:[%s2430_s6 + $0x18] sm:$0xff] }
 0x370   :  { %v583_v33 = vsel %vm582_vm14, %v580_v31, %v1772_v28  ;;  %v584_v34 = vsel %vm582_vm14, %v581_v32, %v1773_v27  ;;  %v1786_v35 = vpop.permute.xlu1 %1785  ;;  %v1700_v28 = vpack.c.bf16 %v942_v26, %v941_v25  ;;  %v944_v31 = vld [vmem:[%s2430_s6 + $0x28] sm:$0xff] }
 0x371   :  { %v1781_v36 = vpop.permute.xlu0 %1780  ;;  %v1788_v39 = vunpack.i.h.bf16 %v1786_v35  ;;  %v1787_v40 = vunpack.i.l.bf16 %v1786_v35  ;;  %v586_v41 = vsel %vm585_vm15, %v583_v33, %v1777_v30  ;;  %v587_v42 = vsel %vm585_vm15, %v584_v34, %v1778_v29  ;;  %v943_v30 = vld [vmem:[%s2430_s6 + $0x20] sm:$0xff] }
 0x372   :  { %v1783_v37 = vunpack.i.h.bf16 %v1781_v36  ;;  %v1782_v38 = vunpack.i.l.bf16 %v1781_v36  ;;  %v1703_v33 = vpack.c.bf16 %v944_v31, %v943_v30  ;;  %v618_v34 = vld [vmem:[%s617_s0] sm:$0xff]  ;;  %v945_v36 = vld [vmem:[%s2430_s6 + $0x30] sm:$0xff] }
 0x374   :  { %v589_v44 = vsel %vm588_vm2, %v586_v41, %v1782_v38  ;;  %v590_v45 = vsel %vm588_vm2, %v587_v42, %v1783_v37  ;;  %v1796_v46 = vpop.permute.xlu1 %1795  ;;  %v946_v37 = vld [vmem:[%s2430_s6 + $0x38] sm:$0xff] }
 0x375   :  { %v1791_v47 = vpop.permute.xlu0 %1790  ;;  %v1798_v50 = vunpack.i.h.bf16 %v1796_v46  ;;  %v1797_v51 = vunpack.i.l.bf16 %v1796_v46  ;;  %v592_v52 = vsel %vm591_vm3, %v589_v44, %v1787_v40  ;;  %v593_v53 = vsel %vm591_vm3, %v590_v45, %v1788_v39  ;;  %v947_v46 = vld [vmem:[%s2430_s6 + $0x40] sm:$0xff] }
 0x376   :  { %v1793_v48 = vunpack.i.h.bf16 %v1791_v47  ;;  %v1792_v49 = vunpack.i.l.bf16 %v1791_v47  ;;  %v1706_v42 = vpack.c.bf16 %v946_v37, %v945_v36  ;;  %v948_v47 = vld [vmem:[%s2430_s6 + $0x48] sm:$0xff] }
 0x378   :  { %v595_v54 = vsel %vm594_vm4, %v592_v52, %v1792_v49  ;;  %v596_v55 = vsel %vm594_vm4, %v593_v53, %v1793_v48  ;;  %v1806_v56 = vpop.permute.xlu1 %1805  ;;  %v619_v48 = vld [vmem:[%s617_s0 + $0x8] sm:$0xff]  ;;  %v1709_v53 = vpack.c.bf16 %v948_v47, %v947_v46  ;;  %v954_v46 = vld [vmem:[%s2430_s6 + $0x78] sm:$0xff] }
 0x379   :  { %v1801_v57 = vpop.permute.xlu0 %1800  ;;  %v1808_v60 = vunpack.i.h.bf16 %v1806_v56  ;;  %v1807_v61 = vunpack.i.l.bf16 %v1806_v56  ;;  %v598_v62 = vsel %vm597_vm5, %v595_v54, %v1797_v51  ;;  %v599_v63 = vsel %vm597_vm5, %v596_v55, %v1798_v50  ;;  %v949_v56 = vld [vmem:[%s2430_s6 + $0x50] sm:$0xff] }
 0x37a   :  { %v1803_v58 = vunpack.i.h.bf16 %v1801_v57  ;;  %v1802_v59 = vunpack.i.l.bf16 %v1801_v57  ;;  %v950_v57 = vld [vmem:[%s2430_s6 + $0x58] sm:$0xff] }
 0x37c   :  { %v601_v0 = vsel %vm600_vm6, %v598_v62, %v1802_v59  ;;  %v602_v4 = vsel %vm600_vm6, %v599_v63, %v1803_v58  ;;  %v1816_v5 = vpop.permute.xlu1 %1815  ;;  %v1712_v62 = vpack.c.bf16 %v950_v57, %v949_v56  ;;  %v1129_v56 = vld [vmem:[%s2433_s9 + $0x18] sm:$0xff] }
 0x37d   :  { %v1811_v9 = vpop.permute.xlu0 %1810  ;;  %v1818_v1 = vunpack.i.h.bf16 %v1816_v5  ;;  %v1817_v2 = vunpack.i.l.bf16 %v1816_v5  ;;  %v604_v7 = vsel %vm603_vm7, %v601_v0, %v1807_v61  ;;  %v605_v6 = vsel %vm603_vm7, %v602_v4, %v1808_v60  ;;  %v951_v0 = vld [vmem:[%s2430_s6 + $0x60] sm:$0xff]  ;;  %v952_v4 = vld [vmem:[%s2430_s6 + $0x68] sm:$0xff] }
 0x37e   :  { %v1813_v10 = vunpack.i.h.bf16 %v1811_v9  ;;  %v1812_v3 = vunpack.i.l.bf16 %v1811_v9 }
 0x380   :  { %v698_v11 = vpop.permute.xlu1 %697  ;;  %v607_v12 = vsel %vm606_vm8, %v604_v7, %v1812_v3  ;;  %v608_v8 = vsel %vm606_vm8, %v605_v6, %v1813_v10  ;;  %v1715_v3 = vpack.c.bf16 %v952_v4, %v951_v0  ;;  %v1437_v4 = vld [vmem:[%s2432_s8] ss:$0 sm:$0xff] }
 0x381   :  { %v1821_v16 = vpop.permute.xlu0 %1820  ;;  %v610_v19 = vsel %vm609_vm9, %v607_v12, %v1817_v2  ;;  %v611_v20 = vsel %vm609_vm9, %v608_v8, %v1818_v1  ;;  %v815_v38 = vsel %vm65_vm0, %v618_v34, %v698_v11 }
 0x382   :  { %v1823_v17 = vunpack.i.h.bf16 %v1821_v16  ;;  %v1822_v18 = vunpack.i.l.bf16 %v1821_v16 }
 0x384   :  { %v706_v22 = vpop.permute.xlu1 %705  ;;  %v613_v23 = vsel %vm612_vm10, %v610_v19, %v1822_v18  ;;  %v614_v24 = vsel %vm612_vm10, %v611_v20, %v1823_v17 }
 0x385   :  { %v700_v27 = vpop.permute.xlu0 %699  ;;  %1549 = vmatprep.mubr.f32.mxu0 %v613_v23  ;;  %v817_v40 = vsel %vm573_vm12, %v815_v38, %v706_v22 }
 0x386   :  { %1550 = vmatmul.mubr.f32.vlgmr.msra.gmra.mrb[0].mxu0 %v614_v24  ;;  %v816_v51 = vsel %vm65_vm0, %v619_v48, %v700_v27  ;;  %vm1301_vm0 = vcmask 7168  }
 0x387   :  { %1698 = vmatpush3.bf16.msra.mxu0 %v1697_v21  ;;  %1619 = vmatprep.mubr.msk.f32.mxu0 %vm1857_vm1, %v1856_v13 }
 0x388   :  { %v714_v29 = vpop.permute.xlu1 %713  ;;  %1699 = vmatprep.subr.bf16.mxu0 %v1873_v43 }
 0x389   :  { %v708_v32 = vpop.permute.xlu0 %707  ;;  %v819_v41 = vsel %vm576_vm13, %v817_v40, %v714_v29 }
 0x38a   :  { %v818_v52 = vsel %vm573_vm12, %v816_v51, %v708_v32 }
 0x38b   :  { %1701 = vmatpush3.bf16.msra.mxu0 %v1700_v28 }
 0x38c   :  { %v722_v35 = vpop.permute.xlu1 %721  ;;  %1702 = vmatprep.subr.bf16.mxu0 %v1873_v43 }
 0x38d   :  { %v716_v39 = vpop.permute.xlu0 %715  ;;  %v821_v44 = vsel %vm352_vm11, %v819_v41, %v722_v35  ;;  %v969_v41 = vld [vmem:[%s2431_s7 + $0x70] sm:$0xff] }
 0x38e   :  { %v820_v54 = vsel %vm576_vm13, %v818_v52, %v716_v39  ;;  %v1126_v52 = vld [vmem:[%s2433_s9] sm:$0xff] }
 0x38f   :  { %1704 = vmatpush3.bf16.msra.mxu0 %v1703_v33 }
 0x390   :  { %v730_v45 = vpop.permute.xlu1 %729  ;;  %1705 = vmatprep.subr.bf16.mxu0 %v1873_v43 }
 0x391   :  { %v823_v49 = vsel %vm582_vm14, %v821_v44, %v730_v45  ;;  %v724_v50 = vpop.permute.xlu0 %723  ;;  %v953_v45 = vld [vmem:[%s2430_s6 + $0x70] sm:$0xff] }
 0x392   :  { %v822_v58 = vsel %vm352_vm11, %v820_v54, %v724_v50  ;;  %v1718_v47 = vpack.c.bf16 %v954_v46, %v953_v45  ;;  %v1128_v54 = vld [vmem:[%s2433_s9 + $0x10] sm:$0xff] }
 0x393   :  { %1707 = vmatpush3.bf16.msra.mxu0 %v1706_v42  ;;  %v970_v42 = vld [vmem:[%s2431_s7 + $0x78] sm:$0xff]  ;;  %v1724_v57 = vpack.c.bf16 %v1129_v56, %v1128_v54 }
 0x394   :  { %v738_v55 = vpop.permute.xlu1 %737  ;;  %1708 = vmatprep.subr.bf16.mxu0 %v1873_v43  ;;  %v1694_v44 = vpack.c.bf16 %v970_v42, %v969_v41 }
 0x395   :  { %v825_v59 = vsel %vm585_vm15, %v823_v49, %v738_v55  ;;  %v732_v60 = vpop.permute.xlu0 %731 }
 0x396   :  { %v824_v61 = vsel %vm582_vm14, %v822_v58, %v732_v60  ;;  %1695 = vmatpush3.bf16.msra.mxu1 %v1694_v44  ;;  %v938_v60 = vld [vmem:[#allocation3] sm:$0xff] }
 0x397   :  { %1710 = vmatpush3.bf16.msra.mxu0 %v1709_v53  ;;  %1720 = vmatprep.subr.bf16.mxu1 %v1873_v43  ;;  %v1127_v53 = vld [vmem:[%s2433_s9 + $0x8] sm:$0xff] }
 0x398   :  { %v746_v63 = vpop.permute.xlu1 %745  ;;  %1711 = vmatprep.subr.bf16.mxu0 %v1873_v43  ;;  %v1721_v55 = vpack.c.bf16 %v1127_v53, %v1126_v52 }
 0x399   :  { %v827_v5 = vsel %vm588_vm2, %v825_v59, %v746_v63  ;;  %v740_v9 = vpop.permute.xlu0 %739 }
 0x39a   :  { %v826_v10 = vsel %vm585_vm15, %v824_v61, %v740_v9 }
 0x39b   :  { %1713 = vmatpush3.bf16.msra.mxu0 %v1712_v62 }
 0x39c   :  { %v754_v1 = vpop.permute.xlu1 %753  ;;  %1714 = vmatprep.subr.bf16.mxu0 %v1873_v43 }
 0x39d   :  { %v829_v2 = vsel %vm591_vm3, %v827_v5, %v754_v1  ;;  %v748_v7 = vpop.permute.xlu0 %747 }
 0x39e   :  { %v828_v6 = vsel %vm588_vm2, %v826_v10, %v748_v7 }
 0x39f   :  { %1716 = vmatpush3.bf16.msra.mxu0 %v1715_v3  ;;  %v1212_v3 = vld [vmem:[%s2435_s11 + $0x8] sm:$0xff] }
 0x3a0   :  { %v762_v11 = vpop.permute.xlu1 %761  ;;  %1717 = vmatprep.subr.bf16.mxu0 %v1873_v43 }
 0x3a1   :  { %v831_v12 = vsel %vm594_vm4, %v829_v2, %v762_v11  ;;  %v756_v8 = vpop.permute.xlu0 %755  ;;  %v1438_v2 = vld [vmem:[%s2434_s10] ss:$0 sm:$0xff] }
 0x3a2   :  { %v830_v14 = vsel %vm591_vm3, %v828_v6, %v756_v8 }
 0x3a3   :  { %1719 = vmatpush3.bf16.msra.mxu0 %v1718_v47 }
 0x3a4   :  { %v770_v15 = vpop.permute.xlu1 %769 }
 0x3a5   :  { %v833_v16 = vsel %vm597_vm5, %v831_v12, %v770_v15  ;;  %v764_v17 = vpop.permute.xlu0 %763 }
 0x3a6   :  { %v832_v18 = vsel %vm594_vm4, %v830_v14, %v764_v17  ;;  %v1293_v14 = vld [vmem:[%s2436_s13] sm:$0xff] }
 0x3a8   :  { %v778_v19 = vpop.permute.xlu1 %777 }
 0x3a9   :  { %v835_v20 = vsel %vm600_vm6, %v833_v16, %v778_v19  ;;  %v772_v21 = vpop.permute.xlu0 %771 }
 0x3aa   :  { %v834_v22 = vsel %vm597_vm5, %v832_v18, %v772_v21 }
 0x3ac   :  { %v786_v23 = vpop.permute.xlu1 %785 }
 0x3ad   :  { %v837_v24 = vsel %vm603_vm7, %v835_v20, %v786_v23  ;;  %v780_v25 = vpop.permute.xlu0 %779 }
 0x3ae   :  { %v836_v26 = vsel %vm600_vm6, %v834_v22, %v780_v25 }
 0x3b0   :  { %v794_v27 = vpop.permute.xlu1 %793 }
 0x3b1   :  { %v839_v28 = vsel %vm606_vm8, %v837_v24, %v794_v27  ;;  %v788_v29 = vpop.permute.xlu0 %787 }
 0x3b2   :  { %v838_v30 = vsel %vm603_vm7, %v836_v26, %v788_v29 }
 0x3b4   :  { %v802_v31 = vpop.permute.xlu1 %801 }
 0x3b5   :  { %v841_v32 = vsel %vm609_vm9, %v839_v28, %v802_v31  ;;  %v796_v33 = vpop.permute.xlu0 %795 }
 0x3b6   :  { %v840_v34 = vsel %vm606_vm8, %v838_v30, %v796_v33 }
 0x3b8   :  { %v810_v35 = vpop.permute.xlu1 %809 }
 0x3b9   :  { %v804_v36 = vpop.permute.xlu0 %803  ;;  %v843_v37 = vsel %vm612_vm10, %v841_v32, %v810_v35 }
 0x3ba   :  { %v842_v38 = vsel %vm609_vm9, %v840_v34, %v804_v36 }
 0x3bd   :  { %v812_v39 = vpop.permute.xlu0 %811 }
 0x3be   :  { %v844_v40 = vsel %vm612_vm10, %v842_v38, %v812_v39 }
 0x459   :  { %v1551_v48 = vpop.f32.mrb[0].mxu0 }
 0x45a   :  { %v937_v49 = vmul.f32 %v1551_v48, %v844_v40  ;;  %v927_v50 = vpop.f32.mrb[1].mxu0 }
 0x45b   :  { %v936_v51 = vmul.f32 %v927_v50, %v843_v37 }
 0x45c   :  { %1585 = vmatmul.mubr.f32.vlgmr.msra.gmra.mrb[4].mxu1 %v937_v49 }
 0x45d   :  { %1620 = vmatmul.mubr.f32.vlgmr.msra.gmra.mrb[2].mxu0 %v936_v51  ;;  %1630 = vmatprep.mubr.msk.f32.mxu1 %vm1857_vm1, %v1856_v13 }
 0x45e   :  { %1722 = vmatpush3.bf16.msra.mxu1 %v1721_v55 }
 0x45f   :  { %1723 = vmatprep.subr.bf16.mxu1 %v1873_v43 }
 0x462   :  { %1725 = vmatpush3.bf16.msra.mxu1 %v1724_v57 }
 0x463   :  { %1726 = vmatprep.subr.bf16.mxu1 %v1873_v43  ;;  %v1211_v43 = vld [vmem:[%s2435_s11] sm:$0xff] }
 0x464   :  { %v1727_v1 = vpack.c.bf16 %v1212_v3, %v1211_v43 }
 0x52f   :  { %v1037_v58 = vpop.f32.mrb[4].mxu1 }
 0x530   :  { %v1586_v59 = vpop.f32.mrb[5].mxu1  ;;  %v1107_v61 = vpop.f32.mrb[2].mxu0 }
 0x531   :  { %v1108_v62 = vadd.f32 %v1107_v61, %v1037_v58  ;;  %v1621_v63 = vpop.f32.mrb[3].mxu0 }
 0x533   :  { %v1111_v0 = vadd.f32 %v1108_v62, %v938_v60 }
 0x535   :  { %1112 = vst.msk [vmem:[#allocation3] sm:$0xff] %vm352_vm11, %v1111_v0 }
 0x53c   :  { %v1116_v5 = vld [vmem:[#allocation3] sm:$0xff] }
 0x53d   :  { %v1124_v9 = vadd.f32 %v1437_v4, %v1116_v5 }
 0x53f   :  { %v1125_v10 = vmax.f32 %v1124_v9, 0.0 }
 0x541   :  { %1631 = vmatmul.mubr.msk.f32.vlgmr.msra.gmra.mrb[6].mxu1 %vm352_vm11, %v1125_v10 }
 0x542   :  { %1637 = vmatprep.mubr.msk.f32.mxu1 %vm1857_vm1, %v1856_v13  ;;  %1728 = vmatpush3.bf16.msra.mxu1 %v1727_v1  ;;  %v1440_v13 = vld [vmem:[#allocation7] ss:$0 sm:$0xff] }
 0x614   :  { %v1206_v7 = vpop.f32.mrb[6].mxu1 }
 0x615   :  { %v1207_v6 = vadd.f32 %v1438_v2, %v1206_v7  ;;  %v1632_v11 = vpop.f32.mrb[7].mxu1 }
 0x617   :  { %v1210_v12 = vmax.f32 %v1207_v6, 0.0 }
 0x619   :  { %1638 = vmatmul.mubr.msk.f32.vlgmr.msra.gmra.mrb[8].mxu1 %vm573_vm12, %v1210_v12 }
 0x6ec   :  { %v1289_v8 = vpop.f32.mrb[8].mxu1 }
 0x6ed   :  { %v1290_v15 = vadd.f32 %v1440_v13, %v1289_v8  ;;  %v1639_v16 = vpop.f32.mrb[9].mxu1 }
 0x6ef   :  { %v1294_v17 = vadd.f32 %v1293_v14, %v1290_v15 }
 0x6f1   :  { %v1442_v18 = vmul.f32 -1.442695, %v1294_v17 }
 0x6f3   :  { %1824 = vpow2.f32 %v1442_v18 }
 0x6fd   :  { %v1825_v19 = vpop.eup %1824 }
 0x6fe   :  { %v1298_v20 = vadd.f32 1.0, %v1825_v19 }
 0x700   :  { %1826 = vrcp.f32 %v1298_v20 }
 0x70a   :  { %v1827_v21 = vpop.eup %1826 }
 0x70b   :  { %1302 = vst.msk [vmem:[%s2437_s14] sm:$0xff] %vm1301_vm0, %v1827_v21 }

</bundles_post_ra>
